<compile_context>
chip_gen: v6e
topology: v6e:2x2x1
jax: 0.10.0
libtpu: 0.0.40
codegen_flags: <defaults>
</compile_context>

<pallas_src>
import jax
import jax.numpy as jnp
from jax.experimental import pallas as pl
from jax.experimental.pallas import tpu as pltpu

KSIZE = 7
PAD = 3


def _make_csab_kernel(h, w):
    """Kernel factory closing over static image height/width."""
    hw = h * w

    def kernel(x_ref, w1_ref, w2_ref, wm_ref, o_ref):
        # x_ref : VMEM (Nb, C, H*W)      input block (C on sublanes, H*W on lanes)
        # w1_ref: VMEM (C, C//16)        fc1 weight (transposed 1x1 conv)
        # w2_ref: VMEM (C//16, C)        fc2 weight (transposed 1x1 conv)
        # wm_ref: VMEM (49, 2*Nb, H*W)   per-tap conv weight * zero-pad validity,
        #                                pre-broadcast over the stacked planes
        # o_ref : VMEM (Nb, C, H*W)      output block
        nb, c, _ = x_ref.shape
        x = x_ref[...].astype(jnp.float32)                  # (Nb, C, HW)

        # ---------------- Channel attention ----------------
        # TODO(synk): on v7x, offload this HW-sum to the MXU as well (dot with a
        # 1/HW column) once the narrow-column->row relayout is verified.
        avg_c = jnp.sum(x, axis=2) * (1.0 / hw)             # AdaptiveAvgPool2d(1) -> (Nb, C)
        max_c = jnp.max(x, axis=2)                          # AdaptiveMaxPool2d(1) -> (Nb, C)
        pooled = jnp.concatenate([avg_c, max_c], axis=0)    # fused MLP batch (2*Nb, C)
        hid = jnp.maximum(
            jnp.dot(pooled, w1_ref[...], preferred_element_type=jnp.float32), 0.0)
        y = jnp.dot(hid, w2_ref[...], preferred_element_type=jnp.float32)  # (2*Nb, C)
        ca = jax.nn.sigmoid(y[:nb] + y[nb:])                # (Nb, C)

        # ---------------- Spatial attention ----------------
        # Channel-mean of x*ca on the (otherwise idle) MXU as a batched matvec;
        # only the channel-max needs the explicit x*ca product, and it is
        # consumed directly by the reduction (no live full-size x_ca temp).
        avg_s = jnp.einsum('nkc,nch->nkh', ca[:, None, :], x,
                           preferred_element_type=jnp.float32)[:, 0, :] * (1.0 / c)
        max_s = jnp.max(x * ca[:, :, None], axis=1)         # (Nb, HW)
        planes = jnp.concatenate([avg_s, max_s], axis=0)    # stacked (2*Nb, HW)

        # 7x7 conv with zero padding == 49 cyclic lane rolls of the stacked
        # planes, each multiplied by a precomputed weight*validity slab.
        acc = jnp.zeros((2 * nb, hw), jnp.float32)
        for t in range(KSIZE * KSIZE):                      # static unroll
            dh, dw = divmod(t, KSIZE)
            src_off = (dh - PAD) * w + (dw - PAD)            # flat source offset for this tap
            shift = (-src_off) % hw
            r = planes if shift == 0 else pltpu.roll(planes, shift, axis=1)
            acc = acc + r * wm_ref[t]                        # contiguous (2*Nb, HW) slice
        sa = jax.nn.sigmoid(acc[:nb] + acc[nb:])            # (Nb, HW)

        # ---------------- Residual (x_ca never materialized) ----------------
        out = x * (1.0 + ca[:, :, None] * sa[:, None, :])   # == x + (x*ca)*sa
        o_ref[...] = out.astype(o_ref.dtype)

    return kernel


def _build_sa_weight_masks(sa_conv_w, h, w, nb):
    """(1, 2, 7, 7) conv weight -> (49, 2*Nb, H*W) slabs of weight * zero-pad
    validity.  Slab t multiplies the lane-rolled stacked planes for tap
    t = dh*7 + dw: rows [0, Nb) weight the channel-mean plane, rows [Nb, 2*Nb)
    weight the channel-max plane."""
    hw = h * w
    idx = jnp.arange(hw)
    row = idx // w
    col = idx % w
    dh = jnp.arange(KSIZE)[:, None, None]
    dw = jnp.arange(KSIZE)[None, :, None]
    r_src = row[None, None, :] + dh - PAD
    c_src = col[None, None, :] + dw - PAD
    valid = ((r_src >= 0) & (r_src < h) & (c_src >= 0) & (c_src < w))
    valid = valid.astype(jnp.float32).reshape(KSIZE * KSIZE, hw)       # (49, HW)
    k = sa_conv_w[0].astype(jnp.float32).reshape(2, KSIZE * KSIZE)     # [avg, max] taps
    w_avg = k[0][:, None] * valid                                      # (49, HW)
    w_max = k[1][:, None] * valid                                      # (49, HW)
    return jnp.concatenate(
        [jnp.broadcast_to(w_avg[:, None, :], (KSIZE * KSIZE, nb, hw)),
         jnp.broadcast_to(w_max[:, None, :], (KSIZE * KSIZE, nb, hw))],
        axis=1)                                                        # (49, 2*Nb, HW)


def _tpu_generation():
    """(physical VMEM bytes, dual-TensorCore chip?) with safe fallbacks."""
    vmem = 64 * 1024 * 1024                      # conservative (v7x per-TC size)
    try:
        vmem = int(pltpu.get_tpu_info().vmem_capacity_bytes)
    except Exception:
        pass
    kind = ""
    try:
        kind = jax.devices()[0].device_kind.lower()
    except Exception:
        pass
    dual_tc = ("v7" in kind) or ("tpu7" in kind) or ("7x" in kind)
    return vmem, dual_tc


def _pick_block_batch(n, per_nb_bytes, budget_bytes, dual_tc):
    """Largest Nb dividing N that fits the VMEM budget.  Dual-TC chips (v7x)
    keep >= 4 grid steps (2 per TensorCore so each core still double-buffers);
    single-TC chips (v5e/v6e) have no minimum-step constraint and allow a
    larger Nb (better per-step-overhead amortization and sublane fill)."""
    cap = max(1, budget_bytes // max(per_nb_bytes, 1))
    min_steps = 4 if dual_tc else 1
    max_nb = 8 if dual_tc else 16
    hi = int(min(max_nb, cap, n))
    best = 1
    for nb in range(1, hi + 1):
        if n % nb == 0 and n // nb >= min_steps:
            best = nb
    return best


def csab_forward(x_nchw, fc1_w, fc2_w, sa_conv_w):
    """x_nchw: (N, C, H, W). fc1_w: (C//16, C, 1, 1). fc2_w: (C, C//16, 1, 1).
    sa_conv_w: (1, 2, 7, 7). Returns (N, C, H, W) in x_nchw.dtype."""
    n, c, h, w = x_nchw.shape
    hw = h * w
    ch = fc1_w.shape[0]
    itemsize = jnp.dtype(x_nchw.dtype).itemsize

    # Generation-aware VMEM budgeting (v7x: 64 MiB/TC; v5e/v6e: 128 MiB).
    phys_vmem, dual_tc = _tpu_generation()
    usable_vmem = max(32 * 1024 * 1024,
                      min(phys_vmem - (8 << 20), int(phys_vmem * 0.8)))

    # Per-Nb VMEM cost: double-buffered in/out blocks, live in-kernel f32
    # temporaries, and the double-buffered expanded conv-weight slabs.
    per_nb = (4 * c * hw * itemsize
              + 4 * c * hw * 4
              + 2 * (2 * KSIZE * KSIZE) * hw * 4)
    fixed = 4 * 1024 * 1024
    nb = _pick_block_batch(n, per_nb, usable_vmem - fixed, dual_tc)
    grid = (n // nb,)

    # Free reshape (trailing dims contiguous) — no layout transposes.
    x_flat = x_nchw.reshape(n, c, hw)
    w1 = fc1_w[:, :, 0, 0].T.astype(jnp.float32)               # (C, C//16)
    w2 = fc2_w[:, :, 0, 0].T.astype(jnp.float32)               # (C//16, C)
    wm = _build_sa_weight_masks(sa_conv_w, h, w, nb)            # (49, 2*Nb, HW)

    vmem_limit = int(min(usable_vmem,
                         max(32 * 1024 * 1024, per_nb * nb + fixed)))
    # TODO(synk): for very large images (C*HW f32 per element >~ 4 MiB) add an
    # H-tiled variant with a 3-row halo so v7x's 64 MiB VMEM stays double-buffered.
    # TODO(synk): pad HW to a multiple of 128 (zero wm pad lanes, -inf-mask the
    # max pools) when H*W is not lane-aligned, to avoid masked partial stores.

    out_flat = pl.pallas_call(
        _make_csab_kernel(h, w),
        out_shape=jax.ShapeDtypeStruct((n, c, hw), x_nchw.dtype),
        grid_spec=pltpu.PrefetchScalarGridSpec(
            num_scalar_prefetch=0,
            grid=grid,
            in_specs=[
                pl.BlockSpec((nb, c, hw), lambda i: (i, 0, 0)),            # x
                pl.BlockSpec((c, ch), lambda i: (0, 0)),                   # fc1.T
                pl.BlockSpec((ch, c), lambda i: (0, 0)),                   # fc2.T
                pl.BlockSpec((KSIZE * KSIZE, 2 * nb, hw),
                             lambda i: (0, 0, 0)),                         # conv wt*mask slabs
            ],
            out_specs=pl.BlockSpec((nb, c, hw), lambda i: (i, 0, 0)),
        ),
        compiler_params=pltpu.CompilerParams(
            dimension_semantics=("parallel",),
            vmem_limit_bytes=vmem_limit,
        ),
    )(x_flat, w1, w2, wm)

    return out_flat.reshape(n, c, h, w)


def _reference(x, fc1_w, fc2_w, sa_conv_w):
    """Pure-JAX NCHW reference mirroring the PyTorch module."""
    w1 = fc1_w[:, :, 0, 0]            # (C//16, C)
    w2 = fc2_w[:, :, 0, 0]            # (C, C//16)
    avg_c = jnp.mean(x, axis=(2, 3))  # (N, C)
    max_c = jnp.max(x, axis=(2, 3))

    def mlp(v):
        return jnp.maximum(v @ w1.T, 0.0) @ w2.T

    ca = jax.nn.sigmoid(mlp(avg_c) + mlp(max_c))[:, :, None, None]
    x_ca = x * ca

    avg_s = jnp.mean(x_ca, axis=1, keepdims=True)
    max_s = jnp.max(x_ca, axis=1, keepdims=True)
    cat = jnp.concatenate([avg_s, max_s], axis=1)            # (N, 2, H, W)
    conv = jax.lax.conv_general_dilated(
        cat, sa_conv_w, window_strides=(1, 1), padding=((PAD, PAD), (PAD, PAD)),
        dimension_numbers=("NCHW", "OIHW", "NCHW"))
    sa = jax.nn.sigmoid(conv)
    return x + x_ca * sa


if __name__ == "__main__":
    key = jax.random.PRNGKey(0)

    def run_case(case_key, n, c, h, w):
        ch = c // 16
        k_x, k1, k2, k3 = jax.random.split(case_key, 4)
        x = jax.random.normal(k_x, (n, c, h, w), dtype=jnp.float32)
        fc1_w = 0.1 * jax.random.normal(k1, (ch, c, 1, 1), dtype=jnp.float32)
        fc2_w = 0.1 * jax.random.normal(k2, (c, ch, 1, 1), dtype=jnp.float32)
        sa_conv_w = 0.1 * jax.random.normal(k3, (1, 2, KSIZE, KSIZE), dtype=jnp.float32)

        out = jax.jit(csab_forward)(x, fc1_w, fc2_w, sa_conv_w)
        jax.block_until_ready(out)

        ref = _reference(x, fc1_w, fc2_w, sa_conv_w)
        assert out.shape == (n, c, h, w)
        assert jnp.allclose(out, ref, atol=1e-4, rtol=1e-4), \
            f"mismatch vs reference for shape {(n, c, h, w)}"

    k_a, k_b = jax.random.split(key)
    run_case(k_a, 2, 32, 16, 16)   # square image (C >= 16 for the ratio-16 bottleneck)
    run_case(k_b, 3, 32, 8, 16)    # H != W + asymmetric conv weight: roll-direction check
    print("KERNEL_OK")
</pallas_src>

<mosaic_0001>
module attributes {stable_mosaic.version = 11 : i64} {
  func.func @kernel(%arg0: i32, %arg1: memref<2x32x256xf32, #tpu.memory_space<vmem>>, %arg2: memref<32x2xf32, #tpu.memory_space<vmem>>, %arg3: memref<2x32xf32, #tpu.memory_space<vmem>>, %arg4: memref<49x4x256xf32, #tpu.memory_space<vmem>>, %arg5: memref<2x32x256xf32, #tpu.memory_space<vmem>>) attributes {dimension_semantics = [#tpu.dimension_semantics<parallel>], iteration_bounds = array<i64: 1>, scalar_prefetch = 0 : i64, scratch_operands = 0 : i64, tpu.core_type = #tpu.core_type<tc>, window_params = [{transform_indices = @transform_0, window_bounds = array<i64: 2, 32, 256>}, {pipeline_mode = #tpu.pipeline_mode<synchronous>, transform_indices = @transform_1, window_bounds = array<i64: 32, 2>}, {pipeline_mode = #tpu.pipeline_mode<synchronous>, transform_indices = @transform_2, window_bounds = array<i64: 2, 32>}, {pipeline_mode = #tpu.pipeline_mode<synchronous>, transform_indices = @transform_3, window_bounds = array<i64: 49, 4, 256>}, {transform_indices = @transform_4, window_bounds = array<i64: 2, 32, 256>}]} {
    %c0 = arith.constant 0 : index
    %c0_0 = arith.constant 0 : index
    %c0_1 = arith.constant 0 : index
    %0 = vector.load %arg1[%c0, %c0_0, %c0_1] : memref<2x32x256xf32, #tpu.memory_space<vmem>>, vector<2x32x256xf32>
    %cst = arith.constant dense<0.000000e+00> : vector<2x32xf32>
    %1 = vector.multi_reduction <add>, %0, %cst [2] : vector<2x32x256xf32> to vector<2x32xf32>
    %cst_2 = arith.constant 3.906250e-03 : f32
    %2 = vector.broadcast %cst_2 : f32 to vector<2x32xf32>
    %3 = arith.mulf %1, %2 : vector<2x32xf32>
    %cst_3 = arith.constant dense<0xFF800000> : vector<2x32xf32>
    %4 = vector.multi_reduction <maximumf>, %0, %cst_3 [2] : vector<2x32x256xf32> to vector<2x32xf32>
    %5 = tpu.concatenate %3, %4 in 0 : vector<2x32xf32>, vector<2x32xf32> -> vector<4x32xf32>
    %c0_4 = arith.constant 0 : index
    %c0_5 = arith.constant 0 : index
    %6 = vector.load %arg2[%c0_4, %c0_5] : memref<32x2xf32, #tpu.memory_space<vmem>>, vector<32x2xf32>
    %cst_6 = arith.constant dense<0.000000e+00> : vector<4x2xf32>
    %7 = tpu.matmul %5, %6, %cst_6 {dimension_numbers = #tpu.dot_dimension_numbers<[1], [0], [0], [1], [0, 0, 1, 1], [], []>} : vector<4x32xf32>, vector<32x2xf32>, vector<4x2xf32> -> vector<4x2xf32>
    %cst_7 = arith.constant 0.000000e+00 : f32
    %8 = vector.broadcast %cst_7 : f32 to vector<4x2xf32>
    %9 = arith.maximumf %7, %8 : vector<4x2xf32>
    %c0_8 = arith.constant 0 : index
    %c0_9 = arith.constant 0 : index
    %10 = vector.load %arg3[%c0_8, %c0_9] : memref<2x32xf32, #tpu.memory_space<vmem>>, vector<2x32xf32>
    %cst_10 = arith.constant dense<0.000000e+00> : vector<4x32xf32>
    %11 = tpu.matmul %9, %10, %cst_10 {dimension_numbers = #tpu.dot_dimension_numbers<[1], [0], [0], [1], [0, 0, 1, 1], [], []>} : vector<4x2xf32>, vector<2x32xf32>, vector<4x32xf32> -> vector<4x32xf32>
    %12 = vector.extract_strided_slice %11 {offsets = [0, 0], sizes = [2, 32], strides = [1, 1]} : vector<4x32xf32> to vector<2x32xf32>
    %13 = vector.extract_strided_slice %11 {offsets = [2, 0], sizes = [2, 32], strides = [1, 1]} : vector<4x32xf32> to vector<2x32xf32>
    %14 = arith.addf %12, %13 : vector<2x32xf32>
    %15 = arith.negf %14 : vector<2x32xf32>
    %16 = math.exp %15 : vector<2x32xf32>
    %cst_11 = arith.constant 1.000000e+00 : f32
    %17 = vector.broadcast %cst_11 : f32 to vector<2x32xf32>
    %18 = arith.addf %17, %16 : vector<2x32xf32>
    %19 = arith.divf %17, %18 : vector<2x32xf32>
    %20 = vector.shape_cast %19 : vector<2x32xf32> to vector<2x1x32xf32>
    "tpu.trace_start"() <{level = 10 : i32, message = "nkc,nch->nkh"}> : () -> ()
    %cst_12 = arith.constant dense<0.000000e+00> : vector<2x1x256xf32>
    %21 = tpu.matmul %20, %0, %cst_12 {dimension_numbers = #tpu.dot_dimension_numbers<[2], [1], [1], [2], [0, 0, 0, 1, 1, 2], [0], [0]>} : vector<2x1x32xf32>, vector<2x32x256xf32>, vector<2x1x256xf32> -> vector<2x1x256xf32>
    "tpu.trace_stop"() : () -> ()
    %22 = vector.shape_cast %21 : vector<2x1x256xf32> to vector<2x256xf32>
    %cst_13 = arith.constant 3.125000e-02 : f32
    %23 = vector.broadcast %cst_13 : f32 to vector<2x256xf32>
    %24 = arith.mulf %22, %23 : vector<2x256xf32>
    %25 = vector.shape_cast %19 : vector<2x32xf32> to vector<2x32x1xf32>
    %26 = vector.broadcast %25 : vector<2x32x1xf32> to vector<2x32x256xf32>
    %27 = arith.mulf %0, %26 : vector<2x32x256xf32>
    %cst_14 = arith.constant dense<0xFF800000> : vector<2x256xf32>
    %28 = vector.multi_reduction <maximumf>, %27, %cst_14 [1] : vector<2x32x256xf32> to vector<2x256xf32>
    %29 = tpu.concatenate %24, %28 in 0 : vector<2x256xf32>, vector<2x256xf32> -> vector<4x256xf32>
    %cst_15 = arith.constant 0.000000e+00 : f32
    %30 = vector.broadcast %cst_15 : f32 to vector<4x256xf32>
    %c51_i32 = arith.constant 51 : i32
    %31 = tpu.dynamic_rotate %29 by %c51_i32 dim 1 : vector<4x256xf32>, i32 -> vector<4x256xf32>
    %c0_16 = arith.constant 0 : index
    %c0_17 = arith.constant 0 : index
    %c0_18 = arith.constant 0 : index
    %32 = vector.load %arg4[%c0_16, %c0_17, %c0_18] : memref<49x4x256xf32, #tpu.memory_space<vmem>>, vector<1x4x256xf32>
    %33 = vector.shape_cast %32 : vector<1x4x256xf32> to vector<4x256xf32>
    %34 = arith.mulf %31, %33 : vector<4x256xf32>
    %35 = arith.addf %30, %34 : vector<4x256xf32>
    %c50_i32 = arith.constant 50 : i32
    %36 = tpu.dynamic_rotate %29 by %c50_i32 dim 1 : vector<4x256xf32>, i32 -> vector<4x256xf32>
    %c1 = arith.constant 1 : index
    %c0_19 = arith.constant 0 : index
    %c0_20 = arith.constant 0 : index
    %37 = vector.load %arg4[%c1, %c0_19, %c0_20] : memref<49x4x256xf32, #tpu.memory_space<vmem>>, vector<1x4x256xf32>
    %38 = vector.shape_cast %37 : vector<1x4x256xf32> to vector<4x256xf32>
    %39 = arith.mulf %36, %38 : vector<4x256xf32>
    %40 = arith.addf %35, %39 : vector<4x256xf32>
    %c49_i32 = arith.constant 49 : i32
    %41 = tpu.dynamic_rotate %29 by %c49_i32 dim 1 : vector<4x256xf32>, i32 -> vector<4x256xf32>
    %c2 = arith.constant 2 : index
    %c0_21 = arith.constant 0 : index
    %c0_22 = arith.constant 0 : index
    %42 = vector.load %arg4[%c2, %c0_21, %c0_22] : memref<49x4x256xf32, #tpu.memory_space<vmem>>, vector<1x4x256xf32>
    %43 = vector.shape_cast %42 : vector<1x4x256xf32> to vector<4x256xf32>
    %44 = arith.mulf %41, %43 : vector<4x256xf32>
    %45 = arith.addf %40, %44 : vector<4x256xf32>
    %c48_i32 = arith.constant 48 : i32
    %46 = tpu.dynamic_rotate %29 by %c48_i32 dim 1 : vector<4x256xf32>, i32 -> vector<4x256xf32>
    %c3 = arith.constant 3 : index
    %c0_23 = arith.constant 0 : index
    %c0_24 = arith.constant 0 : index
    %47 = vector.load %arg4[%c3, %c0_23, %c0_24] : memref<49x4x256xf32, #tpu.memory_space<vmem>>, vector<1x4x256xf32>
    %48 = vector.shape_cast %47 : vector<1x4x256xf32> to vector<4x256xf32>
    %49 = arith.mulf %46, %48 : vector<4x256xf32>
    %50 = arith.addf %45, %49 : vector<4x256xf32>
    %c47_i32 = arith.constant 47 : i32
    %51 = tpu.dynamic_rotate %29 by %c47_i32 dim 1 : vector<4x256xf32>, i32 -> vector<4x256xf32>
    %c4 = arith.constant 4 : index
    %c0_25 = arith.constant 0 : index
    %c0_26 = arith.constant 0 : index
    %52 = vector.load %arg4[%c4, %c0_25, %c0_26] : memref<49x4x256xf32, #tpu.memory_space<vmem>>, vector<1x4x256xf32>
    %53 = vector.shape_cast %52 : vector<1x4x256xf32> to vector<4x256xf32>
    %54 = arith.mulf %51, %53 : vector<4x256xf32>
    %55 = arith.addf %50, %54 : vector<4x256xf32>
    %c46_i32 = arith.constant 46 : i32
    %56 = tpu.dynamic_rotate %29 by %c46_i32 dim 1 : vector<4x256xf32>, i32 -> vector<4x256xf32>
    %c5 = arith.constant 5 : index
    %c0_27 = arith.constant 0 : index
    %c0_28 = arith.constant 0 : index
    %57 = vector.load %arg4[%c5, %c0_27, %c0_28] : memref<49x4x256xf32, #tpu.memory_space<vmem>>, vector<1x4x256xf32>
    %58 = vector.shape_cast %57 : vector<1x4x256xf32> to vector<4x256xf32>
    %59 = arith.mulf %56, %58 : vector<4x256xf32>
    %60 = arith.addf %55, %59 : vector<4x256xf32>
    %c45_i32 = arith.constant 45 : i32
    %61 = tpu.dynamic_rotate %29 by %c45_i32 dim 1 : vector<4x256xf32>, i32 -> vector<4x256xf32>
    %c6 = arith.constant 6 : index
    %c0_29 = arith.constant 0 : index
    %c0_30 = arith.constant 0 : index
    %62 = vector.load %arg4[%c6, %c0_29, %c0_30] : memref<49x4x256xf32, #tpu.memory_space<vmem>>, vector<1x4x256xf32>
    %63 = vector.shape_cast %62 : vector<1x4x256xf32> to vector<4x256xf32>
    %64 = arith.mulf %61, %63 : vector<4x256xf32>
    %65 = arith.addf %60, %64 : vector<4x256xf32>
    %c35_i32 = arith.constant 35 : i32
    %66 = tpu.dynamic_rotate %29 by %c35_i32 dim 1 : vector<4x256xf32>, i32 -> vector<4x256xf32>
    %c7 = arith.constant 7 : index
    %c0_31 = arith.constant 0 : index
    %c0_32 = arith.constant 0 : index
    %67 = vector.load %arg4[%c7, %c0_31, %c0_32] : memref<49x4x256xf32, #tpu.memory_space<vmem>>, vector<1x4x256xf32>
    %68 = vector.shape_cast %67 : vector<1x4x256xf32> to vector<4x256xf32>
    %69 = arith.mulf %66, %68 : vector<4x256xf32>
    %70 = arith.addf %65, %69 : vector<4x256xf32>
    %c34_i32 = arith.constant 34 : i32
    %71 = tpu.dynamic_rotate %29 by %c34_i32 dim 1 : vector<4x256xf32>, i32 -> vector<4x256xf32>
    %c8 = arith.constant 8 : index
    %c0_33 = arith.constant 0 : index
    %c0_34 = arith.constant 0 : index
    %72 = vector.load %arg4[%c8, %c0_33, %c0_34] : memref<49x4x256xf32, #tpu.memory_space<vmem>>, vector<1x4x256xf32>
    %73 = vector.shape_cast %72 : vector<1x4x256xf32> to vector<4x256xf32>
    %74 = arith.mulf %71, %73 : vector<4x256xf32>
    %75 = arith.addf %70, %74 : vector<4x256xf32>
    %c33_i32 = arith.constant 33 : i32
    %76 = tpu.dynamic_rotate %29 by %c33_i32 dim 1 : vector<4x256xf32>, i32 -> vector<4x256xf32>
    %c9 = arith.constant 9 : index
    %c0_35 = arith.constant 0 : index
    %c0_36 = arith.constant 0 : index
    %77 = vector.load %arg4[%c9, %c0_35, %c0_36] : memref<49x4x256xf32, #tpu.memory_space<vmem>>, vector<1x4x256xf32>
    %78 = vector.shape_cast %77 : vector<1x4x256xf32> to vector<4x256xf32>
    %79 = arith.mulf %76, %78 : vector<4x256xf32>
    %80 = arith.addf %75, %79 : vector<4x256xf32>
    %c32_i32 = arith.constant 32 : i32
    %81 = tpu.dynamic_rotate %29 by %c32_i32 dim 1 : vector<4x256xf32>, i32 -> vector<4x256xf32>
    %c10 = arith.constant 10 : index
    %c0_37 = arith.constant 0 : index
    %c0_38 = arith.constant 0 : index
    %82 = vector.load %arg4[%c10, %c0_37, %c0_38] : memref<49x4x256xf32, #tpu.memory_space<vmem>>, vector<1x4x256xf32>
    %83 = vector.shape_cast %82 : vector<1x4x256xf32> to vector<4x256xf32>
    %84 = arith.mulf %81, %83 : vector<4x256xf32>
    %85 = arith.addf %80, %84 : vector<4x256xf32>
    %c31_i32 = arith.constant 31 : i32
    %86 = tpu.dynamic_rotate %29 by %c31_i32 dim 1 : vector<4x256xf32>, i32 -> vector<4x256xf32>
    %c11 = arith.constant 11 : index
    %c0_39 = arith.constant 0 : index
    %c0_40 = arith.constant 0 : index
    %87 = vector.load %arg4[%c11, %c0_39, %c0_40] : memref<49x4x256xf32, #tpu.memory_space<vmem>>, vector<1x4x256xf32>
    %88 = vector.shape_cast %87 : vector<1x4x256xf32> to vector<4x256xf32>
    %89 = arith.mulf %86, %88 : vector<4x256xf32>
    %90 = arith.addf %85, %89 : vector<4x256xf32>
    %c30_i32 = arith.constant 30 : i32
    %91 = tpu.dynamic_rotate %29 by %c30_i32 dim 1 : vector<4x256xf32>, i32 -> vector<4x256xf32>
    %c12 = arith.constant 12 : index
    %c0_41 = arith.constant 0 : index
    %c0_42 = arith.constant 0 : index
    %92 = vector.load %arg4[%c12, %c0_41, %c0_42] : memref<49x4x256xf32, #tpu.memory_space<vmem>>, vector<1x4x256xf32>
    %93 = vector.shape_cast %92 : vector<1x4x256xf32> to vector<4x256xf32>
    %94 = arith.mulf %91, %93 : vector<4x256xf32>
    %95 = arith.addf %90, %94 : vector<4x256xf32>
    %c29_i32 = arith.constant 29 : i32
    %96 = tpu.dynamic_rotate %29 by %c29_i32 dim 1 : vector<4x256xf32>, i32 -> vector<4x256xf32>
    %c13 = arith.constant 13 : index
    %c0_43 = arith.constant 0 : index
    %c0_44 = arith.constant 0 : index
    %97 = vector.load %arg4[%c13, %c0_43, %c0_44] : memref<49x4x256xf32, #tpu.memory_space<vmem>>, vector<1x4x256xf32>
    %98 = vector.shape_cast %97 : vector<1x4x256xf32> to vector<4x256xf32>
    %99 = arith.mulf %96, %98 : vector<4x256xf32>
    %100 = arith.addf %95, %99 : vector<4x256xf32>
    %c19_i32 = arith.constant 19 : i32
    %101 = tpu.dynamic_rotate %29 by %c19_i32 dim 1 : vector<4x256xf32>, i32 -> vector<4x256xf32>
    %c14 = arith.constant 14 : index
    %c0_45 = arith.constant 0 : index
    %c0_46 = arith.constant 0 : index
    %102 = vector.load %arg4[%c14, %c0_45, %c0_46] : memref<49x4x256xf32, #tpu.memory_space<vmem>>, vector<1x4x256xf32>
    %103 = vector.shape_cast %102 : vector<1x4x256xf32> to vector<4x256xf32>
    %104 = arith.mulf %101, %103 : vector<4x256xf32>
    %105 = arith.addf %100, %104 : vector<4x256xf32>
    %c18_i32 = arith.constant 18 : i32
    %106 = tpu.dynamic_rotate %29 by %c18_i32 dim 1 : vector<4x256xf32>, i32 -> vector<4x256xf32>
    %c15 = arith.constant 15 : index
    %c0_47 = arith.constant 0 : index
    %c0_48 = arith.constant 0 : index
    %107 = vector.load %arg4[%c15, %c0_47, %c0_48] : memref<49x4x256xf32, #tpu.memory_space<vmem>>, vector<1x4x256xf32>
    %108 = vector.shape_cast %107 : vector<1x4x256xf32> to vector<4x256xf32>
    %109 = arith.mulf %106, %108 : vector<4x256xf32>
    %110 = arith.addf %105, %109 : vector<4x256xf32>
    %c17_i32 = arith.constant 17 : i32
    %111 = tpu.dynamic_rotate %29 by %c17_i32 dim 1 : vector<4x256xf32>, i32 -> vector<4x256xf32>
    %c16 = arith.constant 16 : index
    %c0_49 = arith.constant 0 : index
    %c0_50 = arith.constant 0 : index
    %112 = vector.load %arg4[%c16, %c0_49, %c0_50] : memref<49x4x256xf32, #tpu.memory_space<vmem>>, vector<1x4x256xf32>
    %113 = vector.shape_cast %112 : vector<1x4x256xf32> to vector<4x256xf32>
    %114 = arith.mulf %111, %113 : vector<4x256xf32>
    %115 = arith.addf %110, %114 : vector<4x256xf32>
    %c16_i32 = arith.constant 16 : i32
    %116 = tpu.dynamic_rotate %29 by %c16_i32 dim 1 : vector<4x256xf32>, i32 -> vector<4x256xf32>
    %c17 = arith.constant 17 : index
    %c0_51 = arith.constant 0 : index
    %c0_52 = arith.constant 0 : index
    %117 = vector.load %arg4[%c17, %c0_51, %c0_52] : memref<49x4x256xf32, #tpu.memory_space<vmem>>, vector<1x4x256xf32>
    %118 = vector.shape_cast %117 : vector<1x4x256xf32> to vector<4x256xf32>
    %119 = arith.mulf %116, %118 : vector<4x256xf32>
    %120 = arith.addf %115, %119 : vector<4x256xf32>
    %c15_i32 = arith.constant 15 : i32
    %121 = tpu.dynamic_rotate %29 by %c15_i32 dim 1 : vector<4x256xf32>, i32 -> vector<4x256xf32>
    %c18 = arith.constant 18 : index
    %c0_53 = arith.constant 0 : index
    %c0_54 = arith.constant 0 : index
    %122 = vector.load %arg4[%c18, %c0_53, %c0_54] : memref<49x4x256xf32, #tpu.memory_space<vmem>>, vector<1x4x256xf32>
    %123 = vector.shape_cast %122 : vector<1x4x256xf32> to vector<4x256xf32>
    %124 = arith.mulf %121, %123 : vector<4x256xf32>
    %125 = arith.addf %120, %124 : vector<4x256xf32>
    %c14_i32 = arith.constant 14 : i32
    %126 = tpu.dynamic_rotate %29 by %c14_i32 dim 1 : vector<4x256xf32>, i32 -> vector<4x256xf32>
    %c19 = arith.constant 19 : index
    %c0_55 = arith.constant 0 : index
    %c0_56 = arith.constant 0 : index
    %127 = vector.load %arg4[%c19, %c0_55, %c0_56] : memref<49x4x256xf32, #tpu.memory_space<vmem>>, vector<1x4x256xf32>
    %128 = vector.shape_cast %127 : vector<1x4x256xf32> to vector<4x256xf32>
    %129 = arith.mulf %126, %128 : vector<4x256xf32>
    %130 = arith.addf %125, %129 : vector<4x256xf32>
    %c13_i32 = arith.constant 13 : i32
    %131 = tpu.dynamic_rotate %29 by %c13_i32 dim 1 : vector<4x256xf32>, i32 -> vector<4x256xf32>
    %c20 = arith.constant 20 : index
    %c0_57 = arith.constant 0 : index
    %c0_58 = arith.constant 0 : index
    %132 = vector.load %arg4[%c20, %c0_57, %c0_58] : memref<49x4x256xf32, #tpu.memory_space<vmem>>, vector<1x4x256xf32>
    %133 = vector.shape_cast %132 : vector<1x4x256xf32> to vector<4x256xf32>
    %134 = arith.mulf %131, %133 : vector<4x256xf32>
    %135 = arith.addf %130, %134 : vector<4x256xf32>
    %c3_i32 = arith.constant 3 : i32
    %136 = tpu.dynamic_rotate %29 by %c3_i32 dim 1 : vector<4x256xf32>, i32 -> vector<4x256xf32>
    %c21 = arith.constant 21 : index
    %c0_59 = arith.constant 0 : index
    %c0_60 = arith.constant 0 : index
    %137 = vector.load %arg4[%c21, %c0_59, %c0_60] : memref<49x4x256xf32, #tpu.memory_space<vmem>>, vector<1x4x256xf32>
    %138 = vector.shape_cast %137 : vector<1x4x256xf32> to vector<4x256xf32>
    %139 = arith.mulf %136, %138 : vector<4x256xf32>
    %140 = arith.addf %135, %139 : vector<4x256xf32>
    %c2_i32 = arith.constant 2 : i32
    %141 = tpu.dynamic_rotate %29 by %c2_i32 dim 1 : vector<4x256xf32>, i32 -> vector<4x256xf32>
    %c22 = arith.constant 22 : index
    %c0_61 = arith.constant 0 : index
    %c0_62 = arith.constant 0 : index
    %142 = vector.load %arg4[%c22, %c0_61, %c0_62] : memref<49x4x256xf32, #tpu.memory_space<vmem>>, vector<1x4x256xf32>
    %143 = vector.shape_cast %142 : vector<1x4x256xf32> to vector<4x256xf32>
    %144 = arith.mulf %141, %143 : vector<4x256xf32>
    %145 = arith.addf %140, %144 : vector<4x256xf32>
    %c1_i32 = arith.constant 1 : i32
    %146 = tpu.dynamic_rotate %29 by %c1_i32 dim 1 : vector<4x256xf32>, i32 -> vector<4x256xf32>
    %c23 = arith.constant 23 : index
    %c0_63 = arith.constant 0 : index
    %c0_64 = arith.constant 0 : index
    %147 = vector.load %arg4[%c23, %c0_63, %c0_64] : memref<49x4x256xf32, #tpu.memory_space<vmem>>, vector<1x4x256xf32>
    %148 = vector.shape_cast %147 : vector<1x4x256xf32> to vector<4x256xf32>
    %149 = arith.mulf %146, %148 : vector<4x256xf32>
    %150 = arith.addf %145, %149 : vector<4x256xf32>
    %c24 = arith.constant 24 : index
    %c0_65 = arith.constant 0 : index
    %c0_66 = arith.constant 0 : index
    %151 = vector.load %arg4[%c24, %c0_65, %c0_66] : memref<49x4x256xf32, #tpu.memory_space<vmem>>, vector<1x4x256xf32>
    %152 = vector.shape_cast %151 : vector<1x4x256xf32> to vector<4x256xf32>
    %153 = arith.mulf %29, %152 : vector<4x256xf32>
    %154 = arith.addf %150, %153 : vector<4x256xf32>
    %c255_i32 = arith.constant 255 : i32
    %155 = tpu.dynamic_rotate %29 by %c255_i32 dim 1 : vector<4x256xf32>, i32 -> vector<4x256xf32>
    %c25 = arith.constant 25 : index
    %c0_67 = arith.constant 0 : index
    %c0_68 = arith.constant 0 : index
    %156 = vector.load %arg4[%c25, %c0_67, %c0_68] : memref<49x4x256xf32, #tpu.memory_space<vmem>>, vector<1x4x256xf32>
    %157 = vector.shape_cast %156 : vector<1x4x256xf32> to vector<4x256xf32>
    %158 = arith.mulf %155, %157 : vector<4x256xf32>
    %159 = arith.addf %154, %158 : vector<4x256xf32>
    %c254_i32 = arith.constant 254 : i32
    %160 = tpu.dynamic_rotate %29 by %c254_i32 dim 1 : vector<4x256xf32>, i32 -> vector<4x256xf32>
    %c26 = arith.constant 26 : index
    %c0_69 = arith.constant 0 : index
    %c0_70 = arith.constant 0 : index
    %161 = vector.load %arg4[%c26, %c0_69, %c0_70] : memref<49x4x256xf32, #tpu.memory_space<vmem>>, vector<1x4x256xf32>
    %162 = vector.shape_cast %161 : vector<1x4x256xf32> to vector<4x256xf32>
    %163 = arith.mulf %160, %162 : vector<4x256xf32>
    %164 = arith.addf %159, %163 : vector<4x256xf32>
    %c253_i32 = arith.constant 253 : i32
    %165 = tpu.dynamic_rotate %29 by %c253_i32 dim 1 : vector<4x256xf32>, i32 -> vector<4x256xf32>
    %c27 = arith.constant 27 : index
    %c0_71 = arith.constant 0 : index
    %c0_72 = arith.constant 0 : index
    %166 = vector.load %arg4[%c27, %c0_71, %c0_72] : memref<49x4x256xf32, #tpu.memory_space<vmem>>, vector<1x4x256xf32>
    %167 = vector.shape_cast %166 : vector<1x4x256xf32> to vector<4x256xf32>
    %168 = arith.mulf %165, %167 : vector<4x256xf32>
    %169 = arith.addf %164, %168 : vector<4x256xf32>
    %c243_i32 = arith.constant 243 : i32
    %170 = tpu.dynamic_rotate %29 by %c243_i32 dim 1 : vector<4x256xf32>, i32 -> vector<4x256xf32>
    %c28 = arith.constant 28 : index
    %c0_73 = arith.constant 0 : index
    %c0_74 = arith.constant 0 : index
    %171 = vector.load %arg4[%c28, %c0_73, %c0_74] : memref<49x4x256xf32, #tpu.memory_space<vmem>>, vector<1x4x256xf32>
    %172 = vector.shape_cast %171 : vector<1x4x256xf32> to vector<4x256xf32>
    %173 = arith.mulf %170, %172 : vector<4x256xf32>
    %174 = arith.addf %169, %173 : vector<4x256xf32>
    %c242_i32 = arith.constant 242 : i32
    %175 = tpu.dynamic_rotate %29 by %c242_i32 dim 1 : vector<4x256xf32>, i32 -> vector<4x256xf32>
    %c29 = arith.constant 29 : index
    %c0_75 = arith.constant 0 : index
    %c0_76 = arith.constant 0 : index
    %176 = vector.load %arg4[%c29, %c0_75, %c0_76] : memref<49x4x256xf32, #tpu.memory_space<vmem>>, vector<1x4x256xf32>
    %177 = vector.shape_cast %176 : vector<1x4x256xf32> to vector<4x256xf32>
    %178 = arith.mulf %175, %177 : vector<4x256xf32>
    %179 = arith.addf %174, %178 : vector<4x256xf32>
    %c241_i32 = arith.constant 241 : i32
    %180 = tpu.dynamic_rotate %29 by %c241_i32 dim 1 : vector<4x256xf32>, i32 -> vector<4x256xf32>
    %c30 = arith.constant 30 : index
    %c0_77 = arith.constant 0 : index
    %c0_78 = arith.constant 0 : index
    %181 = vector.load %arg4[%c30, %c0_77, %c0_78] : memref<49x4x256xf32, #tpu.memory_space<vmem>>, vector<1x4x256xf32>
    %182 = vector.shape_cast %181 : vector<1x4x256xf32> to vector<4x256xf32>
    %183 = arith.mulf %180, %182 : vector<4x256xf32>
    %184 = arith.addf %179, %183 : vector<4x256xf32>
    %c240_i32 = arith.constant 240 : i32
    %185 = tpu.dynamic_rotate %29 by %c240_i32 dim 1 : vector<4x256xf32>, i32 -> vector<4x256xf32>
    %c31 = arith.constant 31 : index
    %c0_79 = arith.constant 0 : index
    %c0_80 = arith.constant 0 : index
    %186 = vector.load %arg4[%c31, %c0_79, %c0_80] : memref<49x4x256xf32, #tpu.memory_space<vmem>>, vector<1x4x256xf32>
    %187 = vector.shape_cast %186 : vector<1x4x256xf32> to vector<4x256xf32>
    %188 = arith.mulf %185, %187 : vector<4x256xf32>
    %189 = arith.addf %184, %188 : vector<4x256xf32>
    %c239_i32 = arith.constant 239 : i32
    %190 = tpu.dynamic_rotate %29 by %c239_i32 dim 1 : vector<4x256xf32>, i32 -> vector<4x256xf32>
    %c32 = arith.constant 32 : index
    %c0_81 = arith.constant 0 : index
    %c0_82 = arith.constant 0 : index
    %191 = vector.load %arg4[%c32, %c0_81, %c0_82] : memref<49x4x256xf32, #tpu.memory_space<vmem>>, vector<1x4x256xf32>
    %192 = vector.shape_cast %191 : vector<1x4x256xf32> to vector<4x256xf32>
    %193 = arith.mulf %190, %192 : vector<4x256xf32>
    %194 = arith.addf %189, %193 : vector<4x256xf32>
    %c238_i32 = arith.constant 238 : i32
    %195 = tpu.dynamic_rotate %29 by %c238_i32 dim 1 : vector<4x256xf32>, i32 -> vector<4x256xf32>
    %c33 = arith.constant 33 : index
    %c0_83 = arith.constant 0 : index
    %c0_84 = arith.constant 0 : index
    %196 = vector.load %arg4[%c33, %c0_83, %c0_84] : memref<49x4x256xf32, #tpu.memory_space<vmem>>, vector<1x4x256xf32>
    %197 = vector.shape_cast %196 : vector<1x4x256xf32> to vector<4x256xf32>
    %198 = arith.mulf %195, %197 : vector<4x256xf32>
    %199 = arith.addf %194, %198 : vector<4x256xf32>
    %c237_i32 = arith.constant 237 : i32
    %200 = tpu.dynamic_rotate %29 by %c237_i32 dim 1 : vector<4x256xf32>, i32 -> vector<4x256xf32>
    %c34 = arith.constant 34 : index
    %c0_85 = arith.constant 0 : index
    %c0_86 = arith.constant 0 : index
    %201 = vector.load %arg4[%c34, %c0_85, %c0_86] : memref<49x4x256xf32, #tpu.memory_space<vmem>>, vector<1x4x256xf32>
    %202 = vector.shape_cast %201 : vector<1x4x256xf32> to vector<4x256xf32>
    %203 = arith.mulf %200, %202 : vector<4x256xf32>
    %204 = arith.addf %199, %203 : vector<4x256xf32>
    %c227_i32 = arith.constant 227 : i32
    %205 = tpu.dynamic_rotate %29 by %c227_i32 dim 1 : vector<4x256xf32>, i32 -> vector<4x256xf32>
    %c35 = arith.constant 35 : index
    %c0_87 = arith.constant 0 : index
    %c0_88 = arith.constant 0 : index
    %206 = vector.load %arg4[%c35, %c0_87, %c0_88] : memref<49x4x256xf32, #tpu.memory_space<vmem>>, vector<1x4x256xf32>
    %207 = vector.shape_cast %206 : vector<1x4x256xf32> to vector<4x256xf32>
    %208 = arith.mulf %205, %207 : vector<4x256xf32>
    %209 = arith.addf %204, %208 : vector<4x256xf32>
    %c226_i32 = arith.constant 226 : i32
    %210 = tpu.dynamic_rotate %29 by %c226_i32 dim 1 : vector<4x256xf32>, i32 -> vector<4x256xf32>
    %c36 = arith.constant 36 : index
    %c0_89 = arith.constant 0 : index
    %c0_90 = arith.constant 0 : index
    %211 = vector.load %arg4[%c36, %c0_89, %c0_90] : memref<49x4x256xf32, #tpu.memory_space<vmem>>, vector<1x4x256xf32>
    %212 = vector.shape_cast %211 : vector<1x4x256xf32> to vector<4x256xf32>
    %213 = arith.mulf %210, %212 : vector<4x256xf32>
    %214 = arith.addf %209, %213 : vector<4x256xf32>
    %c225_i32 = arith.constant 225 : i32
    %215 = tpu.dynamic_rotate %29 by %c225_i32 dim 1 : vector<4x256xf32>, i32 -> vector<4x256xf32>
    %c37 = arith.constant 37 : index
    %c0_91 = arith.constant 0 : index
    %c0_92 = arith.constant 0 : index
    %216 = vector.load %arg4[%c37, %c0_91, %c0_92] : memref<49x4x256xf32, #tpu.memory_space<vmem>>, vector<1x4x256xf32>
    %217 = vector.shape_cast %216 : vector<1x4x256xf32> to vector<4x256xf32>
    %218 = arith.mulf %215, %217 : vector<4x256xf32>
    %219 = arith.addf %214, %218 : vector<4x256xf32>
    %c224_i32 = arith.constant 224 : i32
    %220 = tpu.dynamic_rotate %29 by %c224_i32 dim 1 : vector<4x256xf32>, i32 -> vector<4x256xf32>
    %c38 = arith.constant 38 : index
    %c0_93 = arith.constant 0 : index
    %c0_94 = arith.constant 0 : index
    %221 = vector.load %arg4[%c38, %c0_93, %c0_94] : memref<49x4x256xf32, #tpu.memory_space<vmem>>, vector<1x4x256xf32>
    %222 = vector.shape_cast %221 : vector<1x4x256xf32> to vector<4x256xf32>
    %223 = arith.mulf %220, %222 : vector<4x256xf32>
    %224 = arith.addf %219, %223 : vector<4x256xf32>
    %c223_i32 = arith.constant 223 : i32
    %225 = tpu.dynamic_rotate %29 by %c223_i32 dim 1 : vector<4x256xf32>, i32 -> vector<4x256xf32>
    %c39 = arith.constant 39 : index
    %c0_95 = arith.constant 0 : index
    %c0_96 = arith.constant 0 : index
    %226 = vector.load %arg4[%c39, %c0_95, %c0_96] : memref<49x4x256xf32, #tpu.memory_space<vmem>>, vector<1x4x256xf32>
    %227 = vector.shape_cast %226 : vector<1x4x256xf32> to vector<4x256xf32>
    %228 = arith.mulf %225, %227 : vector<4x256xf32>
    %229 = arith.addf %224, %228 : vector<4x256xf32>
    %c222_i32 = arith.constant 222 : i32
    %230 = tpu.dynamic_rotate %29 by %c222_i32 dim 1 : vector<4x256xf32>, i32 -> vector<4x256xf32>
    %c40 = arith.constant 40 : index
    %c0_97 = arith.constant 0 : index
    %c0_98 = arith.constant 0 : index
    %231 = vector.load %arg4[%c40, %c0_97, %c0_98] : memref<49x4x256xf32, #tpu.memory_space<vmem>>, vector<1x4x256xf32>
    %232 = vector.shape_cast %231 : vector<1x4x256xf32> to vector<4x256xf32>
    %233 = arith.mulf %230, %232 : vector<4x256xf32>
    %234 = arith.addf %229, %233 : vector<4x256xf32>
    %c221_i32 = arith.constant 221 : i32
    %235 = tpu.dynamic_rotate %29 by %c221_i32 dim 1 : vector<4x256xf32>, i32 -> vector<4x256xf32>
    %c41 = arith.constant 41 : index
    %c0_99 = arith.constant 0 : index
    %c0_100 = arith.constant 0 : index
    %236 = vector.load %arg4[%c41, %c0_99, %c0_100] : memref<49x4x256xf32, #tpu.memory_space<vmem>>, vector<1x4x256xf32>
    %237 = vector.shape_cast %236 : vector<1x4x256xf32> to vector<4x256xf32>
    %238 = arith.mulf %235, %237 : vector<4x256xf32>
    %239 = arith.addf %234, %238 : vector<4x256xf32>
    %c211_i32 = arith.constant 211 : i32
    %240 = tpu.dynamic_rotate %29 by %c211_i32 dim 1 : vector<4x256xf32>, i32 -> vector<4x256xf32>
    %c42 = arith.constant 42 : index
    %c0_101 = arith.constant 0 : index
    %c0_102 = arith.constant 0 : index
    %241 = vector.load %arg4[%c42, %c0_101, %c0_102] : memref<49x4x256xf32, #tpu.memory_space<vmem>>, vector<1x4x256xf32>
    %242 = vector.shape_cast %241 : vector<1x4x256xf32> to vector<4x256xf32>
    %243 = arith.mulf %240, %242 : vector<4x256xf32>
    %244 = arith.addf %239, %243 : vector<4x256xf32>
    %c210_i32 = arith.constant 210 : i32
    %245 = tpu.dynamic_rotate %29 by %c210_i32 dim 1 : vector<4x256xf32>, i32 -> vector<4x256xf32>
    %c43 = arith.constant 43 : index
    %c0_103 = arith.constant 0 : index
    %c0_104 = arith.constant 0 : index
    %246 = vector.load %arg4[%c43, %c0_103, %c0_104] : memref<49x4x256xf32, #tpu.memory_space<vmem>>, vector<1x4x256xf32>
    %247 = vector.shape_cast %246 : vector<1x4x256xf32> to vector<4x256xf32>
    %248 = arith.mulf %245, %247 : vector<4x256xf32>
    %249 = arith.addf %244, %248 : vector<4x256xf32>
    %c209_i32 = arith.constant 209 : i32
    %250 = tpu.dynamic_rotate %29 by %c209_i32 dim 1 : vector<4x256xf32>, i32 -> vector<4x256xf32>
    %c44 = arith.constant 44 : index
    %c0_105 = arith.constant 0 : index
    %c0_106 = arith.constant 0 : index
    %251 = vector.load %arg4[%c44, %c0_105, %c0_106] : memref<49x4x256xf32, #tpu.memory_space<vmem>>, vector<1x4x256xf32>
    %252 = vector.shape_cast %251 : vector<1x4x256xf32> to vector<4x256xf32>
    %253 = arith.mulf %250, %252 : vector<4x256xf32>
    %254 = arith.addf %249, %253 : vector<4x256xf32>
    %c208_i32 = arith.constant 208 : i32
    %255 = tpu.dynamic_rotate %29 by %c208_i32 dim 1 : vector<4x256xf32>, i32 -> vector<4x256xf32>
    %c45 = arith.constant 45 : index
    %c0_107 = arith.constant 0 : index
    %c0_108 = arith.constant 0 : index
    %256 = vector.load %arg4[%c45, %c0_107, %c0_108] : memref<49x4x256xf32, #tpu.memory_space<vmem>>, vector<1x4x256xf32>
    %257 = vector.shape_cast %256 : vector<1x4x256xf32> to vector<4x256xf32>
    %258 = arith.mulf %255, %257 : vector<4x256xf32>
    %259 = arith.addf %254, %258 : vector<4x256xf32>
    %c207_i32 = arith.constant 207 : i32
    %260 = tpu.dynamic_rotate %29 by %c207_i32 dim 1 : vector<4x256xf32>, i32 -> vector<4x256xf32>
    %c46 = arith.constant 46 : index
    %c0_109 = arith.constant 0 : index
    %c0_110 = arith.constant 0 : index
    %261 = vector.load %arg4[%c46, %c0_109, %c0_110] : memref<49x4x256xf32, #tpu.memory_space<vmem>>, vector<1x4x256xf32>
    %262 = vector.shape_cast %261 : vector<1x4x256xf32> to vector<4x256xf32>
    %263 = arith.mulf %260, %262 : vector<4x256xf32>
    %264 = arith.addf %259, %263 : vector<4x256xf32>
    %c206_i32 = arith.constant 206 : i32
    %265 = tpu.dynamic_rotate %29 by %c206_i32 dim 1 : vector<4x256xf32>, i32 -> vector<4x256xf32>
    %c47 = arith.constant 47 : index
    %c0_111 = arith.constant 0 : index
    %c0_112 = arith.constant 0 : index
    %266 = vector.load %arg4[%c47, %c0_111, %c0_112] : memref<49x4x256xf32, #tpu.memory_space<vmem>>, vector<1x4x256xf32>
    %267 = vector.shape_cast %266 : vector<1x4x256xf32> to vector<4x256xf32>
    %268 = arith.mulf %265, %267 : vector<4x256xf32>
    %269 = arith.addf %264, %268 : vector<4x256xf32>
    %c205_i32 = arith.constant 205 : i32
    %270 = tpu.dynamic_rotate %29 by %c205_i32 dim 1 : vector<4x256xf32>, i32 -> vector<4x256xf32>
    %c48 = arith.constant 48 : index
    %c0_113 = arith.constant 0 : index
    %c0_114 = arith.constant 0 : index
    %271 = vector.load %arg4[%c48, %c0_113, %c0_114] : memref<49x4x256xf32, #tpu.memory_space<vmem>>, vector<1x4x256xf32>
    %272 = vector.shape_cast %271 : vector<1x4x256xf32> to vector<4x256xf32>
    %273 = arith.mulf %270, %272 : vector<4x256xf32>
    %274 = arith.addf %269, %273 : vector<4x256xf32>
    %275 = vector.extract_strided_slice %274 {offsets = [0, 0], sizes = [2, 256], strides = [1, 1]} : vector<4x256xf32> to vector<2x256xf32>
    %276 = vector.extract_strided_slice %274 {offsets = [2, 0], sizes = [2, 256], strides = [1, 1]} : vector<4x256xf32> to vector<2x256xf32>
    %277 = arith.addf %275, %276 : vector<2x256xf32>
    %278 = arith.negf %277 : vector<2x256xf32>
    %279 = math.exp %278 : vector<2x256xf32>
    %cst_115 = arith.constant 1.000000e+00 : f32
    %280 = vector.broadcast %cst_115 : f32 to vector<2x256xf32>
    %281 = arith.addf %280, %279 : vector<2x256xf32>
    %282 = arith.divf %280, %281 : vector<2x256xf32>
    %283 = vector.shape_cast %19 : vector<2x32xf32> to vector<2x32x1xf32>
    %284 = vector.shape_cast %282 : vector<2x256xf32> to vector<2x1x256xf32>
    %285 = vector.broadcast %283 : vector<2x32x1xf32> to vector<2x32x256xf32>
    %286 = vector.broadcast %284 : vector<2x1x256xf32> to vector<2x32x256xf32>
    %287 = arith.mulf %285, %286 : vector<2x32x256xf32>
    %cst_116 = arith.constant 1.000000e+00 : f32
    %288 = vector.broadcast %cst_116 : f32 to vector<2x32x256xf32>
    %289 = arith.addf %288, %287 : vector<2x32x256xf32>
    %290 = arith.mulf %0, %289 : vector<2x32x256xf32>
    %c0_117 = arith.constant 0 : index
    %c0_118 = arith.constant 0 : index
    %c0_119 = arith.constant 0 : index
    %291 = vector.load %arg5[%c0_117, %c0_118, %c0_119] : memref<2x32x256xf32, #tpu.memory_space<vmem>>, vector<2x32x256xf32>
    tpu.vector_store %arg5[%c0_117, %c0_118, %c0_119], %290 {strides = array<i32>} : memref<2x32x256xf32, #tpu.memory_space<vmem>>, vector<2x32x256xf32>,
    return
  }
  func.func @transform_0(%arg0: i32) -> (i32, i32, i32) {
    %c0_i32 = arith.constant 0 : i32
    %c0_i32_0 = arith.constant 0 : i32
    %c0_i32_1 = arith.constant 0 : i32
    return %arg0, %c0_i32, %c0_i32_0 : i32, i32, i32
  }
  func.func @transform_1(%arg0: i32) -> (i32, i32) {
    %c0_i32 = arith.constant 0 : i32
    %c0_i32_0 = arith.constant 0 : i32
    %c0_i32_1 = arith.constant 0 : i32
    return %c0_i32, %c0_i32_0 : i32, i32
  }
  func.func @transform_2(%arg0: i32) -> (i32, i32) {
    %c0_i32 = arith.constant 0 : i32
    %c0_i32_0 = arith.constant 0 : i32
    %c0_i32_1 = arith.constant 0 : i32
    return %c0_i32, %c0_i32_0 : i32, i32
  }
  func.func @transform_3(%arg0: i32) -> (i32, i32, i32) {
    %c0_i32 = arith.constant 0 : i32
    %c0_i32_0 = arith.constant 0 : i32
    %c0_i32_1 = arith.constant 0 : i32
    %c0_i32_2 = arith.constant 0 : i32
    return %c0_i32, %c0_i32_0, %c0_i32_1 : i32, i32, i32
  }
  func.func @transform_4(%arg0: i32) -> (i32, i32, i32) {
    %c0_i32 = arith.constant 0 : i32
    %c0_i32_0 = arith.constant 0 : i32
    %c0_i32_1 = arith.constant 0 : i32
    return %arg0, %c0_i32, %c0_i32_0 : i32, i32, i32
  }
}

</mosaic_0001>

<bundles_post_ra>
// kernel: squeeze.7
= control target key start
LH: loop header
LB: loop body
LE: loop exit
PB: predicated region body
PF: predicated region fallthrough
CT: control target
= control target key end

     0   :  { %s7_s6 = smov 3  ;;  %s21_s9 = smov 3  ;;  %vm4_vm0 = vcmask 56320   ;;  %vm11_vm1 = vcmask 400720   ;;  %vm18_vm2 = vcmask 343320   ;;  %vm25_vm3 = vcmask 285920   ;;  %s108_s0 = inlined_call_operand.vmem [shape: f32[1,2,7,7], index: 0, kind: input, shape index: {}]   ;;  %s109_s1 = inlined_call_operand.vmem [shape: f32[2,49], index: 1, kind: output, shape index: {}]  }
   0x1   :  { %v56_v0 = vld [vmem:[%s108_s0 + $0x6] ss:$8 sm:%s7_s6]   ;;  %s68_s10 = smov 42   ;;  %v58_v1 = vld [vmem:[%s108_s0 + $0x4] ss:$8 sm:%s21_s9]   ;;  %s14_s13 = smov 3 }
   0x2   :  { %9 = vrot.lane.b32.xlu0 %v56_v0, %s68_s10  ;;  %s69_s14 = smov 28   ;;  %v57_v2 = vld [vmem:[%s108_s0 + $0x5] ss:$8 sm:%s14_s13]   ;;  %s28_s17 = smov 3  ;;  %vm32_vm4 = vcmask 228520   ;;  %vm39_vm5 = vcmask 171120  }
   0x3   :  { %23 = vrot.lane.b32.xlu1 %v58_v1, %s69_s14  ;;  %v59_v3 = vld [vmem:[%s108_s0 + $0x3] ss:$8 sm:%s28_s17]   ;;  %s35_s20 = smov 3  ;;  %s42_s21 = smov 3  ;;  %vm46_vm6 = vcmask 113720  }
   0x4   :  { %s70_s22 = smov 35   ;;  %v60_v4 = vld [vmem:[%s108_s0 + $0x2] ss:$8 sm:%s35_s20]   ;;  %s2_s25 = smov 3  ;;  %v61_v6 = vld [vmem:[%s108_s0 + $0x1] ss:$8 sm:%s42_s21]  }
   0x5   :  { %s71_s26 = smov 21   ;;  %v3_v5 = vld [vmem:[%s108_s0] ss:$8 sm:%s2_s25]   ;;  %s72_s0 = smov 14  }
   0x6   :  { %16 = vrot.lane.b32.xlu0 %v57_v2, %s70_s22  ;;  %5 = vst.msk [vmem:[#allocation0] sm:$0x3] %vm4_vm0, %v3_v5   ;;  %s73_s2 = smov 7  }
   0x7   :  { %30 = vrot.lane.b32.xlu1 %v59_v3, %s71_s26 }
   0xa   :  { %37 = vrot.lane.b32.xlu0 %v60_v4, %s72_s0 }
   0xb   :  { %44 = vrot.lane.b32.xlu1 %v61_v6, %s73_s2 }
  0x74   :  { %v10_v7 = vpop.permute.xlu0 %9  }
  0x75   :  { %12 = vst.msk [vmem:[#allocation0] sm:$0x3] %vm11_vm1, %v10_v7   ;;  %v24_v8 = vpop.permute.xlu1 %23  }
  0x78   :  { %v17_v9 = vpop.permute.xlu0 %16  }
  0x79   :  { %19 = vst.msk [vmem:[#allocation0] sm:$0x3] %vm18_vm2, %v17_v9   ;;  %v31_v10 = vpop.permute.xlu1 %30  }
  0x7a   :  { %26 = vst.msk [vmem:[#allocation0] sm:$0x3] %vm25_vm3, %v24_v8  }
  0x7b   :  { %33 = vst.msk [vmem:[#allocation0] sm:$0x3] %vm32_vm4, %v31_v10  }
  0x7c   :  { %v38_v11 = vpop.permute.xlu0 %37  }
  0x7d   :  { %40 = vst.msk [vmem:[#allocation0] sm:$0x3] %vm39_vm5, %v38_v11   ;;  %v45_v12 = vpop.permute.xlu1 %44  }
  0x7e   :  { %47 = vst.msk [vmem:[#allocation0] sm:$0x3] %vm46_vm6, %v45_v12  }
  0x85   :  { %v52_v13 = vld [vmem:[#allocation0] sm:$0x3] }
  0x86   :  { %55 = vst [vmem:[%s109_s1] sm:$0x3] %v52_v13 }

// kernel: csab_forward.1
= control target key start
LH: loop header
LB: loop body
LE: loop exit
PB: predicated region body
PF: predicated region fallthrough
CT: control target
= control target key end

     0   :  { %v1763_v32 = vmov 0.0   ;;  %vm1764_vm0 = vmmov 0   ;;  %v97_v42 = vlaneseq  ;;  %vm108_vm1 = vcmask 130112   ;;  %s1767_s30 = smov 50   ;;  %s1768_s5 = smov 49   ;;  %s2760_s0 = inlined_call_operand.vmem [shape: f32[2,32,256], index: 0, kind: input, shape index: {}]   ;;  %s2761_s1 = inlined_call_operand.vmem [shape: f32[32,2], index: 1, kind: input, shape index: {}]   ;;  %s2762_s2 = inlined_call_operand.vmem [shape: f32[2,32], index: 2, kind: input, shape index: {}]   ;;  %s2763_s3 = inlined_call_operand.vmem [shape: f32[49,4,256], index: 3, kind: input, shape index: {}]   ;;  %s2764_s4 = inlined_call_operand.vmem [shape: f32[2,32,256], index: 4, kind: output, shape index: {}]  }
   0x1   :  { %v1842_v0 = vld [vmem:[%s2760_s0 + $0x40] sm:$0xff]  ;;  %v1847_v1 = vld [vmem:[%s2760_s0 + $0x48] sm:$0xff]  ;;  %v1864_v5 = vld [vmem:[%s2760_s0 + $0x50] sm:$0xff]  ;;  %1619 = vmatprep.subr.mxu0 %v1763_v32  ;;  %1630 = vmatprep.subr.mxu1 %v1763_v32  ;;  %vm115_vm2 = vcmask 195712   ;;  %vm122_vm3 = vcmask 261312   ;;  %vm143_vm4 = vcmask 1041409  }
   0x2   :  { %v1852_v2 = vld [vmem:[%s2760_s0] sm:$0xff]  ;;  %v45_v3 = vadd.f32 %v1847_v1, %v1842_v0  ;;  %v1859_v4 = vld [vmem:[%s2760_s0 + $0x8] sm:$0xff]  ;;  %v1869_v6 = vld [vmem:[%s2760_s0 + $0x58] sm:$0xff]  ;;  %v77_v27 = vmax.f32 %v1842_v0, %v1847_v1  ;;  %1627 = vmatprep.mubr.msk.f32.mxu0 %vm1764_vm0, %v1763_v32  ;;  %1632 = vmatprep.mubr.msk.f32.mxu1 %vm1764_vm0, %v1763_v32  ;;  %v1971_v45 = vand.u32 127, %v97_v42  ;;  %v1973_v47 = vshrl.u32 %v97_v42, 7  ;;  %s1769_s6 = smov 48  }
   0x3   :  { %v33_v7 = vadd.f32 %v1859_v4, %v1852_v2  ;;  %v1876_v8 = vld [vmem:[%s2760_s0 + $0x10] sm:$0xff]  ;;  %v1881_v9 = vld [vmem:[%s2760_s0 + $0x18] sm:$0xff]  ;;  %v48_v10 = vadd.f32 %v1869_v6, %v1864_v5  ;;  %v1890_v12 = vld [vmem:[%s2760_s0 + $0x60] sm:$0xff]  ;;  %v65_v25 = vmax.f32 %v1852_v2, %v1859_v4  ;;  %v80_v26 = vmax.f32 %v1864_v5, %v1869_v6  ;;  %s1770_s7 = smov 47   ;;  %s1771_s8 = smov 46  }
   0x4   :  { %46 = vadd.xlane.f32.xlu1 %v45_v3  ;;  %v36_v11 = vadd.f32 %v1881_v9, %v1876_v8  ;;  %v1895_v13 = vld [vmem:[%s2760_s0 + $0x68] sm:$0xff]  ;;  %v1900_v14 = vld [vmem:[%s2760_s0 + $0x20] sm:$0xff]  ;;  %v1914_v18 = vld [vmem:[%s2760_s0 + $0x70] sm:$0xff]  ;;  %v68_v24 = vmax.f32 %v1876_v8, %v1881_v9  ;;  %v103_v48 = vadd.s32 4294967288, %v1971_v45  ;;  %v110_v49 = vadd.s32 4294967280, %v1971_v45  ;;  %s1772_s9 = smov 45  }
   0x5   :  { %34 = vadd.xlane.f32.xlu0 %v33_v7  ;;  %v1905_v15 = vld [vmem:[%s2760_s0 + $0x28] sm:$0xff]  ;;  %v51_v16 = vadd.f32 %v1895_v13, %v1890_v12  ;;  %v1919_v19 = vld [vmem:[%s2760_s0 + $0x78] sm:$0xff]  ;;  %v1924_v20 = vld [vmem:[%s2760_s0 + $0x30] sm:$0xff]  ;;  %v83_v28 = vmax.f32 %v1890_v12, %v1895_v13  ;;  %v117_v51 = vadd.s32 4294967272, %v1971_v45  ;;  %v101_v53 = vsub.s32 %v1971_v45, %v1973_v47  ;;  %s1773_s10 = smov 35   ;;  %s1774_s11 = smov 34  }
   0x6   :  { %v39_v17 = vadd.f32 %v1905_v15, %v1900_v14  ;;  %v1929_v21 = vld [vmem:[%s2760_s0 + $0x38] sm:$0xff]  ;;  %v54_v22 = vadd.f32 %v1919_v19, %v1914_v18  ;;  %v71_v29 = vmax.f32 %v1900_v14, %v1905_v15  ;;  %v86_v30 = vmax.f32 %v1914_v18, %v1919_v19  ;;  %v199_v34 = vld [vmem:[%s2761_s1 + $0x10] sm:$0xff]  ;;  %v198_v35 = vld [vmem:[%s2761_s1 + $0x8] sm:$0xff]  ;;  %s1775_s12 = smov 33   ;;  %s1776_s13 = smov 32  }
   0x7   :  { %v42_v23 = vadd.f32 %v1929_v21, %v1924_v20  ;;  %v74_v31 = vmax.f32 %v1924_v20, %v1929_v21  ;;  %v200_v33 = vld [vmem:[%s2761_s1 + $0x18] sm:$0xff]  ;;  %v197_v36 = vld [vmem:[%s2761_s1] sm:$0xff]  ;;  %v106_v54 = vsub.s32 %v103_v48, %v1973_v47  ;;  %v113_v56 = vsub.s32 %v110_v49, %v1973_v47  ;;  %s1777_s14 = smov 31   ;;  %s1778_s15 = smov 30  }
   0x8   :  { %49 = vadd.xlane.f32.xlu1 %v48_v10  ;;  %1620 = vmatpush3.msra.mxu0 %v200_v33  ;;  %v120_v63 = vsub.s32 %v117_v51, %v1973_v47  ;;  %vm192_vm5 = vcmask 1043459   ;;  %vm195_vm6 = vcmask 1041408   ;;  %vm201_vm7 = vcmask 261120   ;;  %s1779_s16 = smov 29   ;;  %s1780_s17 = smov 19  }
   0x9   :  { %37 = vadd.xlane.f32.xlu0 %v36_v11  ;;  %1621 = vmatprep.subr.mxu0 %v1763_v32  ;;  %vm277_vm8 = vcmask 15360   ;;  %s1781_s18 = smov 18   ;;  %s1782_s19 = smov 17   ;;  %vm651_vm9 = vcmp.lt.s32.totalorder %v1971_v45, 51  ;;  %vm666_vm10 = vcmp.lt.s32.totalorder %v1971_v45, 50  ;;  %vm682_vm11 = vcmp.lt.s32.totalorder %v1971_v45, 49 }
   0xa   :  { %1622 = vmatpush3.msra.mxu0 %v199_v34  ;;  %s1783_s20 = smov 16   ;;  %s1784_s21 = smov 15   ;;  %vm698_vm12 = vcmp.lt.s32.totalorder %v1971_v45, 48  ;;  %vm714_vm13 = vcmp.lt.s32.totalorder %v1971_v45, 47  ;;  %vm730_vm14 = vcmp.lt.s32.totalorder %v1971_v45, 46  ;;  %vm746_vm15 = vcmp.lt.s32.totalorder %v1971_v45, 45 }
   0xb   :  { %1623 = vmatprep.subr.mxu0 %v1763_v32  ;;  %s1785_s22 = smov 14   ;;  %s1786_s23 = smov 13   ;;  %vm762_vm0 = vcmp.lt.s32.totalorder %v1971_v45, 35 }
   0xc   :  { %52 = vadd.xlane.f32.xlu1 %v51_v16  ;;  %1624 = vmatpush3.msra.mxu0 %v198_v35  ;;  %s1787_s24 = smov 3   ;;  %s1788_s25 = smov 2  }
   0xd   :  { %40 = vadd.xlane.f32.xlu0 %v39_v17  ;;  %1625 = vmatprep.subr.mxu0 %v1763_v32  ;;  %s1789_s26 = smov 1   ;;  %s1790_s27 = smov 127  }
   0xe   :  { %1626 = vmatpush3.msra.mxu0 %v197_v36  ;;  %s1791_s28 = smov 126   ;;  %s1792_s1 = smov 125  }
   0xf   :  { %486 = vmatprep.subr.mxu0 %v1919_v19  ;;  %s1793_s29 = smov 115  }
  0x10   :  { %55 = vadd.xlane.f32.xlu1 %v54_v22 }
  0x11   :  { %43 = vadd.xlane.f32.xlu0 %v42_v23 }
  0x14   :  { %69 = vmax.xlane.f32.xlu1 %v68_v24 }
  0x15   :  { %66 = vmax.xlane.f32.xlu0 %v65_v25 }
  0x18   :  { %81 = vmax.xlane.f32.xlu1 %v80_v26 }
  0x19   :  { %78 = vmax.xlane.f32.xlu0 %v77_v27 }
  0x1c   :  { %84 = vmax.xlane.f32.xlu1 %v83_v28 }
  0x1d   :  { %72 = vmax.xlane.f32.xlu0 %v71_v29 }
  0x20   :  { %87 = vmax.xlane.f32.xlu1 %v86_v30 }
  0x21   :  { %75 = vmax.xlane.f32.xlu0 %v74_v31 }
  0x8d   :  { %v47_v37 = vpop.xlane.xlu1 %46 }
  0x8e   :  { %v35_v38 = vpop.xlane.xlu0 %34  ;;  %v61_v57 = vmul.f32 0.00390625, %v47_v37 }
  0x8f   :  { %v57_v58 = vmul.f32 0.00390625, %v35_v38 }
  0x90   :  { %v127_v16 = vrot.slane %v61_v57, %v101_v53  ;;  %v276_v57 = vld [vmem:[%s2762_s2] sm:$0x3]  ;;  %s1766_s2 = smov 51  }
  0x91   :  { %v50_v39 = vpop.xlane.xlu1 %49  ;;  %v102_v17 = vrot.slane %v57_v58, %v101_v53  ;;  %1631 = vmatpush3.msk.msra.mxu1 %vm195_vm6, %v276_v57 }
  0x92   :  { %v38_v40 = vpop.xlane.xlu0 %37  ;;  %v62_v55 = vmul.f32 0.00390625, %v50_v39  ;;  %413 = vmatprep.subr.mxu1 %v1929_v21 }
  0x93   :  { %v58_v59 = vmul.f32 0.00390625, %v38_v40 }
  0x94   :  { %v131_v11 = vrot.slane %v62_v55, %v106_v54 }
  0x95   :  { %v53_v41 = vpop.xlane.xlu1 %52  ;;  %v107_v22 = vrot.slane %v58_v59, %v106_v54 }
  0x96   :  { %v41_v43 = vpop.xlane.xlu0 %40  ;;  %v63_v60 = vmul.f32 0.00390625, %v53_v41  ;;  %v132_v35 = vsel %vm108_vm1, %v131_v11, %v127_v16  ;;  %v1765_v11 = vmov 1966171168  }
  0x97   :  { %v59_v62 = vmul.f32 0.00390625, %v41_v43  ;;  %v109_v37 = vsel %vm108_vm1, %v107_v22, %v102_v17  ;;  %v366_v16 = vunpack.c.l.s4 %v1765_v11  ;;  %v2021_v22 = vsub.s32 0, %v1973_v47 }
  0x98   :  { %v136_v23 = vrot.slane %v63_v60, %v113_v56 }
  0x99   :  { %v56_v44 = vpop.xlane.xlu1 %55  ;;  %v114_v25 = vrot.slane %v59_v62, %v113_v56  ;;  %v367_v17 = vunpack.c.0.s8 %v366_v16 }
  0x9a   :  { %v44_v46 = vpop.xlane.xlu0 %43  ;;  %v64_v3 = vmul.f32 0.00390625, %v56_v44  ;;  %v137_v38 = vsel %vm115_vm2, %v136_v23, %v132_v35 }
  0x9b   :  { %v60_v10 = vmul.f32 0.00390625, %v44_v46  ;;  %v116_v40 = vsel %vm115_vm2, %v114_v25, %v109_v37  ;;  %v2024_v23 = vsub.s32 %v367_v17, %v1973_v47 }
  0x9c   :  { %v141_v26 = vrot.slane %v64_v3, %v120_v63 }
  0x9d   :  { %v70_v50 = vpop.xlane.xlu1 %69  ;;  %v121_v30 = vrot.slane %v60_v10, %v120_v63 }
  0x9e   :  { %v67_v52 = vpop.xlane.xlu0 %66  ;;  %v161_v31 = vrot.slane %v70_v50, %v106_v54  ;;  %v142_v44 = vsel %vm122_vm3, %v141_v26, %v137_v38 }
  0x9f   :  { %v157_v33 = vrot.slane %v67_v52, %v101_v53  ;;  %v123_v50 = vsel %vm122_vm3, %v121_v30, %v116_v40 }
  0xa1   :  { %v82_v61 = vpop.xlane.xlu1 %81  ;;  %v162_v46 = vsel %vm108_vm1, %v161_v31, %v157_v33 }
  0xa2   :  { %v79_v7 = vpop.xlane.xlu0 %78  ;;  %v180_v27 = vrot.slane %v82_v61, %v106_v54  ;;  %v144_v54 = vsel %vm143_vm4, %v142_v44, %v123_v50 }
  0xa3   :  { %v176_v28 = vrot.slane %v79_v7, %v101_v53 }
  0xa5   :  { %v85_v24 = vpop.xlane.xlu1 %84  ;;  %v181_v41 = vsel %vm108_vm1, %v180_v27, %v176_v28  ;;  %v2029_v27 = vsub.s32 1, %v1973_v47  ;;  %vm778_vm1 = vcmp.lt.s32.totalorder %v1971_v45, 34 }
  0xa6   :  { %v73_v29 = vpop.xlane.xlu0 %72  ;;  %v185_v34 = vrot.slane %v85_v24, %v113_v56 }
  0xa7   :  { %v166_v36 = vrot.slane %v73_v29, %v113_v56 }
  0xa8   :  { %v186_v48 = vsel %vm115_vm2, %v185_v34, %v181_v41 }
  0xa9   :  { %v88_v39 = vpop.xlane.xlu1 %87  ;;  %v167_v51 = vsel %vm115_vm2, %v166_v36, %v162_v46  ;;  %vm794_vm2 = vcmp.lt.s32.totalorder %v1971_v45, 33 }
  0xaa   :  { %v190_v42 = vrot.slane %v88_v39, %v120_v63  ;;  %v76_v43 = vpop.xlane.xlu0 %75 }
  0xab   :  { %v171_v49 = vrot.slane %v76_v43, %v120_v63 }
  0xac   :  { %v191_v52 = vsel %vm122_vm3, %v190_v42, %v186_v48 }
  0xad   :  { %v172_v53 = vsel %vm122_vm3, %v171_v49, %v167_v51  ;;  %vm810_vm3 = vcmp.lt.s32.totalorder %v1971_v45, 32 }
  0xae   :  { %v193_v55 = vsel %vm192_vm5, %v191_v52, %v172_v53 }
  0xaf   :  { %v196_v56 = vsel %vm195_vm6, %v144_v54, %v193_v55 }
  0xb0   :  { %1628 = vmatmul.mubr.msk.f32.vlgmr.msra.gmra.mxu0 %vm201_vm7, %v196_v56 }
  0xb1   :  { %487 = vmatpush1.msra.mxu0 %v1914_v18  ;;  %526 = vmatprep.mubr.f32.mxu0 %v1763_v32 }
  0xb2   :  { %488 = vmatprep.subr.mxu0 %v1895_v13 }
  0xb3   :  { %489 = vmatpush1.msra.mxu0 %v1890_v12 }
  0xb4   :  { %490 = vmatprep.subr.mxu0 %v1869_v6 }
  0xb5   :  { %491 = vmatpush1.msra.mxu0 %v1864_v5 }
  0xb6   :  { %492 = vmatprep.subr.mxu0 %v1847_v1 }
  0xb7   :  { %493 = vmatpush1.msra.mxu0 %v1842_v0 }
 0x170   :  { %v271_v58 = vpop.f32.mrf.mxu0 }
 0x171   :  { %v275_v59 = vmax.f32 %v271_v58, 0.0 }
 0x172   :  { %v1629_v60 = vpop.f32.mrf.mxu0 }
 0x173   :  { %1633 = vmatmul.mubr.msk.f32.vlgmr.msra.gmra.mxu1 %vm277_vm8, %v275_v59  ;;  %vm890_vm8 = vcmp.lt.s32.totalorder %v1971_v45, 18 }
 0x174   :  { %414 = vmatpush1.msra.mxu1 %v1924_v20  ;;  %453 = vmatprep.mubr.f32.mxu1 %v1763_v32 }
 0x175   :  { %415 = vmatprep.subr.mxu1 %v1905_v15 }
 0x176   :  { %416 = vmatpush1.msra.mxu1 %v1900_v14 }
 0x177   :  { %417 = vmatprep.subr.mxu1 %v1881_v9 }
 0x178   :  { %418 = vmatpush1.msra.mxu1 %v1876_v8 }
 0x179   :  { %419 = vmatprep.subr.mxu1 %v1859_v4 }
 0x17a   :  { %420 = vmatpush1.msra.mxu1 %v1852_v2 }
 0x233   :  { %v350_v61 = vpop.f32.mrf.mxu1 }
 0x234   :  { %v355_v62 = vrot.slane %v350_v61, 2 }
 0x235   :  { %v1634_v63 = vpop.f32.mrf.mxu1 }
 0x236   :  { %v357_v3 = vadd.f32 %v355_v62, %v350_v61 }
 0x238   :  { %v1559_v7 = vmul.f32 -1.442695, %v357_v3 }
 0x23a   :  { %1735 = vpow2.f32 %v1559_v7 }
 0x247   :  { %v1736_v10 = vpop.eup %1735 }
 0x248   :  { %v361_v32 = vadd.f32 1.0, %v1736_v10 }
 0x24a   :  { %1737 = vrcp.f32 %v361_v32 }
 0x257   :  { %v1738_v24 = vpop.eup %1737 }
 0x258   :  { %v540_v25 = vrot.slane %v1738_v24, %v2021_v22  ;;  %v371_v26 = vrot.slane %v1738_v24, %v2024_v23  ;;  %v559_v30 = vrot.slane %v1738_v24, %v2029_v27 }
 0x25a   :  { %546 = vbcast.lane.b32.xlu1 %v540_v25, 264  ;;  %542 = vbcast.lane.b32.xlu0 %v540_v25, 256  ;;  %v379_v28 = vrot.slane %v371_v26, %v2024_v23  ;;  %v372_v29 = vcombine.high %v371_v26, %v371_v26 }
 0x25c   :  { %1560 = vmatmul.mubr.msk.f32.vlgmr.msra.gmra.mxu1 %vm201_vm7, %v379_v28  ;;  %v386_v31 = vrot.slane %v372_v29, %v2024_v23 }
 0x25e   :  { %561 = vbcast.lane.b32.xlu1 %v559_v30, 256  ;;  %550 = vbcast.lane.b32.xlu0 %v540_v25, 272 }
 0x25f   :  { %1561 = vmatmul.mubr.msk.f32.vlgmr.msra.gmra.mxu0 %vm201_vm7, %v386_v31  ;;  %vm874_vm7 = vcmp.lt.s32.totalorder %v1971_v45, 19 }
 0x262   :  { %565 = vbcast.lane.b32.xlu1 %v559_v30, 264  ;;  %554 = vbcast.lane.b32.xlu0 %v540_v25, 280 }
 0x266   :  { %569 = vbcast.lane.b32.xlu1 %v559_v30, 272 }
 0x26a   :  { %573 = vbcast.lane.b32.xlu1 %v559_v30, 280 }
 0x2cc   :  { %v2036_v47 = vpop.permute.xlu1 %546  ;;  %v2042_v35 = vpop.permute.xlu0 %542 }
 0x2cd   :  { %v577_v39 = vmul.f32 %v2036_v47, %v1876_v8  ;;  %v575_v40 = vmul.f32 %v2042_v35, %v1852_v2  ;;  %v576_v8 = vmul.f32 %v2042_v35, %v1859_v4 }
 0x2d0   :  { %v2038_v33 = vpop.permute.xlu1 %561  ;;  %v2046_v37 = vpop.permute.xlu0 %550 }
 0x2d1   :  { %2773 = vst [vmem:[#allocation2_spill] sm:$0xff] %v2038_v33  ;;  %v583_v42 = vmul.f32 %v2038_v33, %v1842_v0  ;;  %v579_v2 = vmul.f32 %v2046_v37, %v1900_v14  ;;  %v584_v0 = vmul.f32 %v2038_v33, %v1847_v1 }
 0x2d4   :  { %v2040_v34 = vpop.permute.xlu1 %565  ;;  %v2060_v44 = vpop.permute.xlu0 %554 }
 0x2d5   :  { %2774 = vst [vmem:[#allocation3_spill] sm:$0xff] %v2040_v34  ;;  %v585_v38 = vmul.f32 %v2040_v34, %v1864_v5  ;;  %v586_v43 = vmul.f32 %v2040_v34, %v1869_v6  ;;  %v578_v5 = vmul.f32 %v2036_v47, %v1881_v9  ;;  %v580_v9 = vmul.f32 %v2046_v37, %v1905_v15 }
 0x2d6   :  { %v581_v4 = vmul.f32 %v2060_v44, %v1924_v20 }
 0x2d7   :  { %v609_v48 = vmax.f32 %v583_v42, %v585_v38  ;;  %v618_v50 = vmax.f32 %v584_v0, %v586_v43  ;;  %v600_v1 = vmax.f32 %v576_v8, %v578_v5 }
 0x2d8   :  { %v2044_v36 = vpop.permute.xlu1 %569 }
 0x2d9   :  { %2775 = vst [vmem:[#allocation4_spill] sm:$0xff] %v2044_v36  ;;  %v587_v46 = vmul.f32 %v2044_v36, %v1890_v12  ;;  %v588_v6 = vmul.f32 %v2044_v36, %v1895_v13  ;;  %v591_v12 = vmax.f32 %v575_v40, %v577_v39  ;;  %v582_v13 = vmul.f32 %v2060_v44, %v1929_v21 }
 0x2db   :  { %v610_v51 = vmax.f32 %v609_v48, %v587_v46  ;;  %v592_v52 = vmax.f32 %v591_v12, %v579_v2  ;;  %v619_v53 = vmax.f32 %v618_v50, %v588_v6 }
 0x2dc   :  { %v2054_v41 = vpop.permute.xlu1 %573 }
 0x2dd   :  { %2776 = vst [vmem:[#allocation5_spill] sm:$0xff] %v2054_v41  ;;  %v589_v49 = vmul.f32 %v2054_v41, %v1914_v18  ;;  %v590_v14 = vmul.f32 %v2054_v41, %v1919_v19  ;;  %v601_v18 = vmax.f32 %v600_v1, %v580_v9  ;;  %v593_v55 = vmax.f32 %v592_v52, %v581_v4 }
 0x2df   :  { %v611_v54 = vmax.f32 %v610_v51, %v589_v49  ;;  %v620_v56 = vmax.f32 %v619_v53, %v590_v14  ;;  %v602_v57 = vmax.f32 %v601_v18, %v582_v13  ;;  %v594_v58 = vrot.slane %v593_v55, 4  ;;  %v654_v51 = vld [vmem:[%s2763_s3] sm:$0xff]  ;;  %v1562_v14 = vld [vmem:[%s2763_s3 + $0x8] sm:$0xff] }
 0x2e0   :  { %v656_v53 = vcombine.high %v654_v51, %v654_v51  ;;  %v672_v18 = vcombine.high %v1562_v14, %v1562_v14 }
 0x2e1   :  { %v612_v15 = vrot.slane %v611_v54, 4  ;;  %v621_v59 = vrot.slane %v620_v56, 4  ;;  %v603_v20 = vrot.slane %v602_v57, 4  ;;  %v595_v61 = vmax.f32 %v593_v55, %v594_v58  ;;  %v1563_v55 = vld [vmem:[%s2763_s3 + $0x10] sm:$0xff] }
 0x2e2   :  { %v688_v58 = vcombine.high %v1563_v55, %v1563_v55 }
 0x2e3   :  { %v613_v60 = vmax.f32 %v611_v54, %v612_v15  ;;  %v622_v62 = vmax.f32 %v620_v56, %v621_v59  ;;  %v604_v63 = vmax.f32 %v602_v57, %v603_v20  ;;  %v596_v3 = vrot.slane %v595_v61, 2 }
 0x2e5   :  { %v614_v19 = vrot.slane %v613_v60, 2  ;;  %v623_v7 = vrot.slane %v622_v62, 2  ;;  %v605_v10 = vrot.slane %v604_v63, 2  ;;  %v597_v21 = vmax.f32 %v595_v61, %v596_v3 }
 0x2e7   :  { %v615_v32 = vmax.f32 %v613_v60, %v614_v19  ;;  %v624_v11 = vmax.f32 %v622_v62, %v623_v7  ;;  %v606_v16 = vmax.f32 %v604_v63, %v605_v10  ;;  %v598_v24 = vrot.slane %v597_v21, 1  ;;  %v1564_v63 = vld [vmem:[%s2763_s3 + $0x18] sm:$0xff] }
 0x2e9   :  { %v616_v17 = vrot.slane %v615_v32, 1  ;;  %v625_v26 = vrot.slane %v624_v11, 1  ;;  %v607_v28 = vrot.slane %v606_v16, 1  ;;  %v599_v38 = vmax.f32 %v597_v21, %v598_v24  ;;  %v1565_v24 = vld [vmem:[%s2763_s3 + $0x20] sm:$0xff] }
 0x2eb   :  { %v617_v30 = vmax.f32 %v615_v32, %v616_v17  ;;  %v626_v42 = vmax.f32 %v624_v11, %v625_v26  ;;  %v608_v8 = vmax.f32 %v606_v16, %v607_v28  ;;  %v704_v17 = vcombine.high %v1564_v63, %v1564_v63 }
 0x2ed   :  { %v641_v2 = vsel %vm192_vm5, %v617_v30, %v599_v38  ;;  %v642_v12 = vsel %vm192_vm5, %v626_v42, %v608_v8  ;;  %v1566_v42 = vld [vmem:[%s2763_s3 + $0x28] sm:$0xff]  ;;  %vm842_vm5 = vcmp.lt.s32.totalorder %v1971_v45, 30 }
 0x31c   :  { %v455_v25 = vpop.f32.mrf.mxu1 }
 0x31d   :  { %v533_v43 = vmul.f32 0.03125, %v455_v25 }
 0x31e   :  { %v457_v39 = vpop.f32.mrf.mxu1 }
 0x31f   :  { %v528_v29 = vpop.f32.mrf.mxu0  ;;  %v534_v0 = vmul.f32 0.03125, %v457_v39 }
 0x320   :  { %v535_v31 = vmul.f32 0.03125, %v528_v29 }
 0x321   :  { %v530_v40 = vpop.f32.mrf.mxu0 }
 0x322   :  { %v631_v46 = vrot.slane %v535_v31, 7  ;;  %v536_v5 = vmul.f32 0.03125, %v530_v40  ;;  %v720_v40 = vcombine.high %v1565_v24, %v1565_v24 }
 0x324   :  { %v632_v48 = vsel %vm143_vm4, %v631_v46, %v533_v43  ;;  %v633_v6 = vrot.slane %v536_v5, 7 }
 0x325   :  { %v2087_v49 = vsel %vm195_vm6, %v632_v48, %v641_v2 }
 0x326   :  { %v634_v9 = vsel %vm143_vm4, %v633_v6, %v534_v0  ;;  %647 = vrot.lane.b32.xlu0 %v2087_v49, %s1766_s2  ;;  %vm826_vm4 = vcmp.lt.s32.totalorder %v1971_v45, 31 }
 0x327   :  { %v2093_v4 = vsel %vm195_vm6, %v634_v9, %v642_v12  ;;  %v736_v12 = vcombine.high %v1566_v42, %v1566_v42  ;;  %v1567_v9 = vld [vmem:[%s2763_s3 + $0x30] sm:$0xff]  ;;  %vm858_vm6 = vcmp.lt.s32.totalorder %v1971_v45, 29 }
 0x328   :  { %649 = vrot.lane.b32.xlu1 %v2093_v4, %s1766_s2  ;;  %s1794_s2 = smov 114  }
 0x32a   :  { %662 = vrot.lane.b32.xlu0 %v2087_v49, %s1767_s30 }
 0x32c   :  { %664 = vrot.lane.b32.xlu1 %v2093_v4, %s1767_s30  ;;  %s1803_s30 = smov 96  }
 0x32e   :  { %678 = vrot.lane.b32.xlu0 %v2087_v49, %s1768_s5 }
 0x330   :  { %680 = vrot.lane.b32.xlu1 %v2093_v4, %s1768_s5 }
 0x332   :  { %694 = vrot.lane.b32.xlu0 %v2087_v49, %s1769_s6 }
 0x334   :  { %696 = vrot.lane.b32.xlu1 %v2093_v4, %s1769_s6 }
 0x336   :  { %710 = vrot.lane.b32.xlu0 %v2087_v49, %s1770_s7 }
 0x338   :  { %712 = vrot.lane.b32.xlu1 %v2093_v4, %s1770_s7  ;;  %s1804_s7 = smov 95  }
 0x33a   :  { %726 = vrot.lane.b32.xlu0 %v2087_v49, %s1771_s8 }
 0x33c   :  { %728 = vrot.lane.b32.xlu1 %v2093_v4, %s1771_s8  ;;  %s1795_s8 = smov 113  }
 0x33e   :  { %742 = vrot.lane.b32.xlu0 %v2087_v49, %s1772_s9 }
 0x340   :  { %744 = vrot.lane.b32.xlu1 %v2093_v4, %s1772_s9 }
 0x342   :  { %758 = vrot.lane.b32.xlu0 %v2087_v49, %s1773_s10 }
 0x344   :  { %760 = vrot.lane.b32.xlu1 %v2093_v4, %s1773_s10  ;;  %s1805_s10 = smov 94  }
 0x346   :  { %774 = vrot.lane.b32.xlu0 %v2087_v49, %s1774_s11 }
 0x348   :  { %776 = vrot.lane.b32.xlu1 %v2093_v4, %s1774_s11  ;;  %s1796_s11 = smov 112  }
 0x34a   :  { %790 = vrot.lane.b32.xlu0 %v2087_v49, %s1775_s12 }
 0x34c   :  { %792 = vrot.lane.b32.xlu1 %v2093_v4, %s1775_s12 }
 0x34e   :  { %806 = vrot.lane.b32.xlu0 %v2087_v49, %s1776_s13 }
 0x350   :  { %808 = vrot.lane.b32.xlu1 %v2093_v4, %s1776_s13  ;;  %s1806_s13 = smov 93  }
 0x352   :  { %822 = vrot.lane.b32.xlu0 %v2087_v49, %s1777_s14 }
 0x354   :  { %824 = vrot.lane.b32.xlu1 %v2093_v4, %s1777_s14  ;;  %s1797_s14 = smov 111  }
 0x356   :  { %838 = vrot.lane.b32.xlu0 %v2087_v49, %s1778_s15 }
 0x358   :  { %840 = vrot.lane.b32.xlu1 %v2093_v4, %s1778_s15 }
 0x35a   :  { %854 = vrot.lane.b32.xlu0 %v2087_v49, %s1779_s16 }
 0x35c   :  { %856 = vrot.lane.b32.xlu1 %v2093_v4, %s1779_s16  ;;  %s1807_s16 = smov 83  }
 0x35e   :  { %870 = vrot.lane.b32.xlu0 %v2087_v49, %s1780_s17 }
 0x360   :  { %872 = vrot.lane.b32.xlu1 %v2093_v4, %s1780_s17  ;;  %s1798_s17 = smov 110  }
 0x362   :  { %886 = vrot.lane.b32.xlu0 %v2087_v49, %s1781_s18 }
 0x364   :  { %888 = vrot.lane.b32.xlu1 %v2093_v4, %s1781_s18 }
 0x366   :  { %902 = vrot.lane.b32.xlu0 %v2087_v49, %s1782_s19 }
 0x368   :  { %904 = vrot.lane.b32.xlu1 %v2093_v4, %s1782_s19  ;;  %s1808_s19 = smov 82  }
 0x36a   :  { %918 = vrot.lane.b32.xlu0 %v2087_v49, %s1783_s20 }
 0x36c   :  { %920 = vrot.lane.b32.xlu1 %v2093_v4, %s1783_s20  ;;  %s1799_s20 = smov 109  }
 0x36e   :  { %934 = vrot.lane.b32.xlu0 %v2087_v49, %s1784_s21 }
 0x370   :  { %936 = vrot.lane.b32.xlu1 %v2093_v4, %s1784_s21  ;;  %s1810_s21 = smov 80  }
 0x372   :  { %950 = vrot.lane.b32.xlu0 %v2087_v49, %s1785_s22 }
 0x374   :  { %952 = vrot.lane.b32.xlu1 %v2093_v4, %s1785_s22  ;;  %s1811_s22 = smov 79  }
 0x376   :  { %966 = vrot.lane.b32.xlu0 %v2087_v49, %s1786_s23 }
 0x378   :  { %968 = vrot.lane.b32.xlu1 %v2093_v4, %s1786_s23  ;;  %s1800_s23 = smov 99  }
 0x37a   :  { %982 = vrot.lane.b32.xlu0 %v2087_v49, %s1787_s24 }
 0x37c   :  { %984 = vrot.lane.b32.xlu1 %v2093_v4, %s1787_s24  ;;  %s1813_s24 = smov 77  }
 0x37e   :  { %998 = vrot.lane.b32.xlu0 %v2087_v49, %s1788_s25 }
 0x380   :  { %1000 = vrot.lane.b32.xlu1 %v2093_v4, %s1788_s25 }
 0x382   :  { %1014 = vrot.lane.b32.xlu0 %v2087_v49, %s1789_s26 }
 0x384   :  { %1016 = vrot.lane.b32.xlu1 %v2093_v4, %s1789_s26  ;;  %s1801_s26 = smov 98  }
 0x386   :  { %1039 = vrot.lane.b32.xlu0 %v2087_v49, %s1790_s27 }
 0x388   :  { %1041 = vrot.lane.b32.xlu1 %v2093_v4, %s1790_s27 }
 0x38a   :  { %1055 = vrot.lane.b32.xlu0 %v2087_v49, %s1791_s28 }
 0x38c   :  { %1057 = vrot.lane.b32.xlu1 %v2093_v4, %s1791_s28 }
 0x38e   :  { %1071 = vrot.lane.b32.xlu0 %v2087_v49, %s1792_s1 }
 0x390   :  { %1073 = vrot.lane.b32.xlu1 %v2093_v4, %s1792_s1  ;;  %s1802_s1 = smov 97  }
 0x392   :  { %1087 = vrot.lane.b32.xlu0 %v2087_v49, %s1793_s29 }
 0x394   :  { %1089 = vrot.lane.b32.xlu1 %v2093_v4, %s1793_s29 }
 0x396   :  { %1103 = vrot.lane.b32.xlu0 %v2087_v49, %s1794_s2 }
 0x398   :  { %v648_v50 = vpop.permute.xlu0 %647  ;;  %1105 = vrot.lane.b32.xlu1 %v2093_v4, %s1794_s2 }
 0x39a   :  { %1119 = vrot.lane.b32.xlu0 %v2087_v49, %s1795_s8  ;;  %v650_v1 = vpop.permute.xlu1 %649 }
 0x39b   :  { %v652_v52 = vsel %vm651_vm9, %v648_v50, %v650_v1  ;;  %v653_v13 = vsel %vm651_vm9, %v650_v1, %v648_v50  ;;  %vm906_vm9 = vcmp.lt.s32.totalorder %v1971_v45, 17 }
 0x39c   :  { %v663_v54 = vpop.permute.xlu0 %662  ;;  %1121 = vrot.lane.b32.xlu1 %v2093_v4, %s1795_s8  ;;  %v658_v59 = vmul.f32 %v654_v51, %v653_v13  ;;  %v659_v20 = vmul.f32 %v656_v53, %v652_v52 }
 0x39e   :  { %1135 = vrot.lane.b32.xlu0 %v2087_v49, %s1796_s11  ;;  %v665_v56 = vpop.permute.xlu1 %664 }
 0x39f   :  { %v667_v57 = vsel %vm666_vm10, %v663_v54, %v665_v56  ;;  %v668_v15 = vsel %vm666_vm10, %v665_v56, %v663_v54  ;;  %vm922_vm10 = vcmp.lt.s32.totalorder %v1971_v45, 16 }
 0x3a0   :  { %v674_v60 = vmul.f32 %v1562_v14, %v668_v15  ;;  %v675_v61 = vmul.f32 %v672_v18, %v667_v57  ;;  %v679_v62 = vpop.permute.xlu0 %678  ;;  %1137 = vrot.lane.b32.xlu1 %v2093_v4, %s1796_s11  ;;  %v752_v18 = vcombine.high %v1567_v9, %v1567_v9 }
 0x3a2   :  { %v676_v19 = vadd.f32 %v674_v60, %v658_v59  ;;  %v677_v3 = vadd.f32 %v675_v61, %v659_v20  ;;  %1151 = vrot.lane.b32.xlu0 %v2087_v49, %s1797_s14  ;;  %v681_v7 = vpop.permute.xlu1 %680 }
 0x3a3   :  { %v683_v10 = vsel %vm682_vm11, %v679_v62, %v681_v7  ;;  %v684_v32 = vsel %vm682_vm11, %v681_v7, %v679_v62  ;;  %vm938_vm11 = vcmp.lt.s32.totalorder %v1971_v45, 15 }
 0x3a4   :  { %v690_v21 = vmul.f32 %v1563_v55, %v684_v32  ;;  %v691_v11 = vmul.f32 %v688_v58, %v683_v10  ;;  %v695_v16 = vpop.permute.xlu0 %694  ;;  %1153 = vrot.lane.b32.xlu1 %v2093_v4, %s1797_s14  ;;  %v1568_v55 = vld [vmem:[%s2763_s3 + $0x38] sm:$0xff] }
 0x3a5   :  { %v768_v62 = vcombine.high %v1568_v55, %v1568_v55 }
 0x3a6   :  { %v692_v25 = vadd.f32 %v690_v21, %v676_v19  ;;  %v693_v26 = vadd.f32 %v691_v11, %v677_v3  ;;  %1167 = vrot.lane.b32.xlu0 %v2087_v49, %s1798_s17  ;;  %v697_v28 = vpop.permute.xlu1 %696 }
 0x3a7   :  { %v699_v29 = vsel %vm698_vm12, %v695_v16, %v697_v28  ;;  %v700_v30 = vsel %vm698_vm12, %v697_v28, %v695_v16  ;;  %vm954_vm12 = vcmp.lt.s32.totalorder %v1971_v45, 14 }
 0x3a8   :  { %v706_v31 = vmul.f32 %v1564_v63, %v700_v30  ;;  %v707_v38 = vmul.f32 %v704_v17, %v699_v29  ;;  %v711_v39 = vpop.permute.xlu0 %710  ;;  %1169 = vrot.lane.b32.xlu1 %v2093_v4, %s1798_s17  ;;  %v1569_v63 = vld [vmem:[%s2763_s3 + $0x40] sm:$0xff] }
 0x3a9   :  { %v784_v17 = vcombine.high %v1569_v63, %v1569_v63 }
 0x3aa   :  { %v708_v43 = vadd.f32 %v706_v31, %v692_v25  ;;  %v709_v46 = vadd.f32 %v707_v38, %v693_v26  ;;  %1183 = vrot.lane.b32.xlu0 %v2087_v49, %s1799_s20  ;;  %v713_v5 = vpop.permute.xlu1 %712 }
 0x3ab   :  { %v715_v8 = vsel %vm714_vm13, %v711_v39, %v713_v5  ;;  %v716_v2 = vsel %vm714_vm13, %v713_v5, %v711_v39  ;;  %vm970_vm13 = vcmp.lt.s32.totalorder %v1971_v45, 13 }
 0x3ac   :  { %v722_v0 = vmul.f32 %v1565_v24, %v716_v2  ;;  %v723_v48 = vmul.f32 %v720_v40, %v715_v8  ;;  %v727_v6 = vpop.permute.xlu0 %726  ;;  %1185 = vrot.lane.b32.xlu1 %v2093_v4, %s1799_s20  ;;  %v1570_v24 = vld [vmem:[%s2763_s3 + $0x48] sm:$0xff]  ;;  %s1809_s20 = smov 81  }
 0x3ad   :  { %v800_v40 = vcombine.high %v1570_v24, %v1570_v24 }
 0x3ae   :  { %v724_v50 = vadd.f32 %v722_v0, %v708_v43  ;;  %v725_v51 = vadd.f32 %v723_v48, %v709_v46  ;;  %1199 = vrot.lane.b32.xlu0 %v2087_v49, %s1800_s23  ;;  %v729_v14 = vpop.permute.xlu1 %728 }
 0x3af   :  { %v731_v1 = vsel %vm730_vm14, %v727_v6, %v729_v14  ;;  %v732_v52 = vsel %vm730_vm14, %v729_v14, %v727_v6  ;;  %vm986_vm14 = vcmp.lt.s32.totalorder %v1971_v45, 3 }
 0x3b0   :  { %v738_v13 = vmul.f32 %v1566_v42, %v732_v52  ;;  %v739_v53 = vmul.f32 %v736_v12, %v731_v1  ;;  %v743_v54 = vpop.permute.xlu0 %742  ;;  %1201 = vrot.lane.b32.xlu1 %v2093_v4, %s1800_s23  ;;  %v1571_v42 = vld [vmem:[%s2763_s3 + $0x50] sm:$0xff]  ;;  %s1812_s23 = smov 78  }
 0x3b1   :  { %v816_v12 = vcombine.high %v1571_v42, %v1571_v42 }
 0x3b2   :  { %v740_v56 = vadd.f32 %v738_v13, %v724_v50  ;;  %v741_v57 = vadd.f32 %v739_v53, %v725_v51  ;;  %1215 = vrot.lane.b32.xlu0 %v2087_v49, %s1801_s26  ;;  %v745_v15 = vpop.permute.xlu1 %744 }
 0x3b3   :  { %v747_v58 = vsel %vm746_vm15, %v743_v54, %v745_v15  ;;  %v748_v59 = vsel %vm746_vm15, %v745_v15, %v743_v54  ;;  %vm1002_vm15 = vcmp.lt.s32.totalorder %v1971_v45, 2 }
 0x3b4   :  { %v754_v20 = vmul.f32 %v1567_v9, %v748_v59  ;;  %v755_v60 = vmul.f32 %v752_v18, %v747_v58  ;;  %v759_v61 = vpop.permute.xlu0 %758  ;;  %1217 = vrot.lane.b32.xlu1 %v2093_v4, %s1801_s26  ;;  %v1572_v9 = vld [vmem:[%s2763_s3 + $0x58] sm:$0xff] }
 0x3b5   :  { %v832_v18 = vcombine.high %v1572_v9, %v1572_v9 }
 0x3b6   :  { %v756_v19 = vadd.f32 %v754_v20, %v740_v56  ;;  %v757_v3 = vadd.f32 %v755_v60, %v741_v57  ;;  %1231 = vrot.lane.b32.xlu0 %v2087_v49, %s1802_s1  ;;  %v761_v7 = vpop.permute.xlu1 %760 }
 0x3b7   :  { %v763_v10 = vsel %vm762_vm0, %v759_v61, %v761_v7  ;;  %v764_v32 = vsel %vm762_vm0, %v761_v7, %v759_v61  ;;  %vm1018_vm0 = vcmp.lt.s32.totalorder %v1971_v45, 1 }
 0x3b8   :  { %v770_v21 = vmul.f32 %v1568_v55, %v764_v32  ;;  %v771_v11 = vmul.f32 %v768_v62, %v763_v10  ;;  %v775_v16 = vpop.permute.xlu0 %774  ;;  %1233 = vrot.lane.b32.xlu1 %v2093_v4, %s1802_s1  ;;  %v1573_v55 = vld [vmem:[%s2763_s3 + $0x60] sm:$0xff] }
 0x3b9   :  { %v848_v62 = vcombine.high %v1573_v55, %v1573_v55 }
 0x3ba   :  { %v772_v25 = vadd.f32 %v770_v21, %v756_v19  ;;  %v773_v26 = vadd.f32 %v771_v11, %v757_v3  ;;  %1247 = vrot.lane.b32.xlu0 %v2087_v49, %s1803_s30  ;;  %v777_v28 = vpop.permute.xlu1 %776 }
 0x3bb   :  { %v779_v29 = vsel %vm778_vm1, %v775_v16, %v777_v28  ;;  %v780_v30 = vsel %vm778_vm1, %v777_v28, %v775_v16  ;;  %vm1043_vm1 = vcmp.lt.s32.totalorder %v1971_v45, 127 }
 0x3bc   :  { %v786_v31 = vmul.f32 %v1569_v63, %v780_v30  ;;  %v787_v38 = vmul.f32 %v784_v17, %v779_v29  ;;  %v791_v39 = vpop.permute.xlu0 %790  ;;  %1249 = vrot.lane.b32.xlu1 %v2093_v4, %s1803_s30  ;;  %v1574_v63 = vld [vmem:[%s2763_s3 + $0x68] sm:$0xff] }
 0x3bd   :  { %v864_v17 = vcombine.high %v1574_v63, %v1574_v63 }
 0x3be   :  { %v788_v43 = vadd.f32 %v786_v31, %v772_v25  ;;  %v789_v46 = vadd.f32 %v787_v38, %v773_v26  ;;  %1263 = vrot.lane.b32.xlu0 %v2087_v49, %s1804_s7  ;;  %v793_v5 = vpop.permute.xlu1 %792 }
 0x3bf   :  { %v795_v8 = vsel %vm794_vm2, %v791_v39, %v793_v5  ;;  %v796_v2 = vsel %vm794_vm2, %v793_v5, %v791_v39  ;;  %vm1059_vm2 = vcmp.lt.s32.totalorder %v1971_v45, 126 }
 0x3c0   :  { %v802_v0 = vmul.f32 %v1570_v24, %v796_v2  ;;  %v803_v48 = vmul.f32 %v800_v40, %v795_v8  ;;  %v807_v6 = vpop.permute.xlu0 %806  ;;  %1265 = vrot.lane.b32.xlu1 %v2093_v4, %s1804_s7  ;;  %v1575_v24 = vld [vmem:[%s2763_s3 + $0x70] sm:$0xff] }
 0x3c1   :  { %v880_v40 = vcombine.high %v1575_v24, %v1575_v24 }
 0x3c2   :  { %v804_v50 = vadd.f32 %v802_v0, %v788_v43  ;;  %v805_v51 = vadd.f32 %v803_v48, %v789_v46  ;;  %1279 = vrot.lane.b32.xlu0 %v2087_v49, %s1805_s10  ;;  %v809_v14 = vpop.permute.xlu1 %808 }
 0x3c3   :  { %v811_v1 = vsel %vm810_vm3, %v807_v6, %v809_v14  ;;  %v812_v52 = vsel %vm810_vm3, %v809_v14, %v807_v6  ;;  %vm1075_vm3 = vcmp.lt.s32.totalorder %v1971_v45, 125 }
 0x3c4   :  { %v818_v13 = vmul.f32 %v1571_v42, %v812_v52  ;;  %v819_v53 = vmul.f32 %v816_v12, %v811_v1  ;;  %v823_v54 = vpop.permute.xlu0 %822  ;;  %1281 = vrot.lane.b32.xlu1 %v2093_v4, %s1805_s10 }
 0x3c6   :  { %v820_v56 = vadd.f32 %v818_v13, %v804_v50  ;;  %v821_v57 = vadd.f32 %v819_v53, %v805_v51  ;;  %1295 = vrot.lane.b32.xlu0 %v2087_v49, %s1806_s13  ;;  %v825_v15 = vpop.permute.xlu1 %824 }
 0x3c7   :  { %v827_v58 = vsel %vm826_vm4, %v823_v54, %v825_v15  ;;  %v828_v59 = vsel %vm826_vm4, %v825_v15, %v823_v54  ;;  %vm1091_vm4 = vcmp.lt.s32.totalorder %v1971_v45, 115 }
 0x3c8   :  { %v834_v20 = vmul.f32 %v1572_v9, %v828_v59  ;;  %v835_v60 = vmul.f32 %v832_v18, %v827_v58  ;;  %v839_v61 = vpop.permute.xlu0 %838  ;;  %1297 = vrot.lane.b32.xlu1 %v2093_v4, %s1806_s13 }
 0x3ca   :  { %v836_v19 = vadd.f32 %v834_v20, %v820_v56  ;;  %v837_v3 = vadd.f32 %v835_v60, %v821_v57  ;;  %1311 = vrot.lane.b32.xlu0 %v2087_v49, %s1807_s16  ;;  %v841_v7 = vpop.permute.xlu1 %840 }
 0x3cb   :  { %v843_v10 = vsel %vm842_vm5, %v839_v61, %v841_v7  ;;  %v844_v32 = vsel %vm842_vm5, %v841_v7, %v839_v61  ;;  %vm1107_vm5 = vcmp.lt.s32.totalorder %v1971_v45, 114 }
 0x3cc   :  { %v850_v21 = vmul.f32 %v1573_v55, %v844_v32  ;;  %v851_v11 = vmul.f32 %v848_v62, %v843_v10  ;;  %v855_v16 = vpop.permute.xlu0 %854  ;;  %1313 = vrot.lane.b32.xlu1 %v2093_v4, %s1807_s16 }
 0x3ce   :  { %v852_v25 = vadd.f32 %v850_v21, %v836_v19  ;;  %v853_v26 = vadd.f32 %v851_v11, %v837_v3  ;;  %1327 = vrot.lane.b32.xlu0 %v2087_v49, %s1808_s19  ;;  %v857_v28 = vpop.permute.xlu1 %856  ;;  %v1576_v21 = vld [vmem:[%s2763_s3 + $0x78] sm:$0xff] }
 0x3cf   :  { %v859_v29 = vsel %vm858_vm6, %v855_v16, %v857_v28  ;;  %v860_v30 = vsel %vm858_vm6, %v857_v28, %v855_v16  ;;  %v1577_v16 = vld [vmem:[%s2763_s3 + $0x80] sm:$0xff]  ;;  %v1578_v28 = vld [vmem:[%s2763_s3 + $0x88] sm:$0xff]  ;;  %vm1123_vm6 = vcmp.lt.s32.totalorder %v1971_v45, 113 }
 0x3d0   :  { %v866_v31 = vmul.f32 %v1574_v63, %v860_v30  ;;  %v867_v38 = vmul.f32 %v864_v17, %v859_v29  ;;  %v871_v39 = vpop.permute.xlu0 %870  ;;  %1329 = vrot.lane.b32.xlu1 %v2093_v4, %s1808_s19  ;;  %v896_v17 = vcombine.high %v1576_v21, %v1576_v21  ;;  %v912_v29 = vcombine.high %v1577_v16, %v1577_v16 }
 0x3d2   :  { %v868_v42 = vadd.f32 %v866_v31, %v852_v25  ;;  %v869_v43 = vadd.f32 %v867_v38, %v853_v26  ;;  %1343 = vrot.lane.b32.xlu0 %v2087_v49, %s1809_s20  ;;  %v873_v46 = vpop.permute.xlu1 %872 }
 0x3d3   :  { %v875_v5 = vsel %vm874_vm7, %v871_v39, %v873_v46  ;;  %v876_v8 = vsel %vm874_vm7, %v873_v46, %v871_v39  ;;  %v1579_v39 = vld [vmem:[%s2763_s3 + $0x90] sm:$0xff]  ;;  %v1580_v46 = vld [vmem:[%s2763_s3 + $0x98] sm:$0xff]  ;;  %vm1139_vm7 = vcmp.lt.s32.totalorder %v1971_v45, 112 }
 0x3d4   :  { %v882_v2 = vmul.f32 %v1575_v24, %v876_v8  ;;  %v883_v0 = vmul.f32 %v880_v40, %v875_v5  ;;  %v887_v48 = vpop.permute.xlu0 %886  ;;  %1345 = vrot.lane.b32.xlu1 %v2093_v4, %s1809_s20 }
 0x3d6   :  { %v2242_v6 = vadd.f32 %v882_v2, %v868_v42  ;;  %v2244_v12 = vadd.f32 %v883_v0, %v869_v43  ;;  %1359 = vrot.lane.b32.xlu0 %v2087_v49, %s1810_s21  ;;  %v889_v9 = vpop.permute.xlu1 %888  ;;  %v928_v43 = vcombine.high %v1578_v28, %v1578_v28 }
 0x3d7   :  { %v891_v25 = vsel %vm890_vm8, %v887_v48, %v889_v9  ;;  %v892_v26 = vsel %vm890_vm8, %v889_v9, %v887_v48  ;;  %v944_v9 = vcombine.high %v1579_v39, %v1579_v39  ;;  %vm1155_vm8 = vcmp.lt.s32.totalorder %v1971_v45, 111 }
 0x3d8   :  { %v903_v50 = vpop.permute.xlu0 %902  ;;  %1361 = vrot.lane.b32.xlu1 %v2093_v4, %s1810_s21  ;;  %v898_v40 = vmul.f32 %v1576_v21, %v892_v26  ;;  %v899_v42 = vmul.f32 %v896_v17, %v891_v25  ;;  %v960_v25 = vcombine.high %v1580_v46, %v1580_v46 }
 0x3da   :  { %1375 = vrot.lane.b32.xlu0 %v2087_v49, %s1811_s22  ;;  %v905_v51 = vpop.permute.xlu1 %904  ;;  %v900_v26 = vadd.f32 %v898_v40, %v2242_v6  ;;  %v1583_v6 = vld [vmem:[%s2763_s3 + $0xb0] sm:$0xff] }
 0x3db   :  { %v907_v31 = vsel %vm906_vm9, %v903_v50, %v905_v51  ;;  %v908_v38 = vsel %vm906_vm9, %v905_v51, %v903_v50  ;;  %v1581_v50 = vld [vmem:[%s2763_s3 + $0xa0] sm:$0xff]  ;;  %vm1171_vm9 = vcmp.lt.s32.totalorder %v1971_v45, 110 }
 0x3dc   :  { %v919_v14 = vpop.permute.xlu0 %918  ;;  %1377 = vrot.lane.b32.xlu1 %v2093_v4, %s1811_s22  ;;  %v914_v0 = vmul.f32 %v1577_v16, %v908_v38  ;;  %v915_v48 = vmul.f32 %v912_v29, %v907_v31  ;;  %v1582_v29 = vld [vmem:[%s2763_s3 + $0xa8] sm:$0xff]  ;;  %v976_v36 = vcombine.high %v1581_v50, %v1581_v50 }
 0x3de   :  { %1391 = vrot.lane.b32.xlu0 %v2087_v49, %s1812_s23  ;;  %v921_v1 = vpop.permute.xlu1 %920 }
 0x3df   :  { %v923_v8 = vsel %vm922_vm10, %v919_v14, %v921_v1  ;;  %v924_v2 = vsel %vm922_vm10, %v921_v1, %v919_v14  ;;  %v901_v14 = vadd.f32 %v899_v42, %v2244_v12  ;;  %vm1187_vm10 = vcmp.lt.s32.totalorder %v1971_v45, 109 }
 0x3e0   :  { %v935_v52 = vpop.permute.xlu0 %934  ;;  %1393 = vrot.lane.b32.xlu1 %v2093_v4, %s1812_s23  ;;  %v930_v1 = vmul.f32 %v1578_v28, %v924_v2  ;;  %v931_v16 = vmul.f32 %v928_v43, %v923_v8  ;;  %v1584_v8 = vld [vmem:[%s2763_s3 + $0xb8] sm:$0xff] }
 0x3e2   :  { %1407 = vrot.lane.b32.xlu0 %v2087_v49, %s1813_s24  ;;  %v937_v13 = vpop.permute.xlu1 %936 }
 0x3e3   :  { %v939_v21 = vsel %vm938_vm11, %v935_v52, %v937_v13  ;;  %v940_v17 = vsel %vm938_vm11, %v937_v13, %v935_v52  ;;  %v916_v52 = vadd.f32 %v914_v0, %v900_v26  ;;  %v917_v13 = vadd.f32 %v915_v48, %v901_v14 }
 0x3e4   :  { %v951_v53 = vpop.permute.xlu0 %950  ;;  %1409 = vrot.lane.b32.xlu1 %v2093_v4, %s1813_s24  ;;  %v946_v34 = vmul.f32 %v1579_v39, %v940_v17  ;;  %v947_v33 = vmul.f32 %v944_v9, %v939_v21  ;;  %vm1203_vm11 = vcmp.lt.s32.totalorder %v1971_v45, 99 }
 0x3e5   :  { %v932_v39 = vadd.f32 %v930_v1, %v916_v52  ;;  %v933_v40 = vadd.f32 %v931_v16, %v917_v13 }
 0x3e6   :  { %v953_v54 = vpop.permute.xlu1 %952 }
 0x3e7   :  { %v955_v38 = vsel %vm954_vm12, %v951_v53, %v953_v54  ;;  %v956_v41 = vsel %vm954_vm12, %v953_v54, %v951_v53  ;;  %v992_v54 = vcombine.high %v1582_v29, %v1582_v29  ;;  %vm1219_vm12 = vcmp.lt.s32.totalorder %v1971_v45, 98 }
 0x3e8   :  { %v2254_v18 = vpop.permute.xlu0 %966  ;;  %v962_v42 = vmul.f32 %v1580_v46, %v956_v41  ;;  %v963_v43 = vmul.f32 %v960_v25, %v955_v38  ;;  %v948_v41 = vadd.f32 %v946_v34, %v932_v39  ;;  %v949_v46 = vadd.f32 %v947_v33, %v933_v40 }
 0x3ea   :  { %v2256_v55 = vpop.permute.xlu1 %968  ;;  %v965_v26 = vadd.f32 %v963_v43, %v949_v46 }
 0x3eb   :  { %v971_v28 = vsel %vm970_vm13, %v2254_v18, %v2256_v55  ;;  %v972_v53 = vsel %vm970_vm13, %v2256_v55, %v2254_v18  ;;  %v1008_v55 = vcombine.high %v1583_v6, %v1583_v6  ;;  %vm1235_vm13 = vcmp.lt.s32.totalorder %v1971_v45, 97 }
 0x3ec   :  { %v2258_v56 = vpop.permute.xlu0 %982  ;;  %v978_v48 = vmul.f32 %v1581_v50, %v972_v53  ;;  %v979_v9 = vmul.f32 %v976_v36, %v971_v28 }
 0x3ee   :  { %v2260_v57 = vpop.permute.xlu1 %984  ;;  %v981_v16 = vadd.f32 %v979_v9, %v965_v26 }
 0x3ef   :  { %v987_v0 = vsel %vm986_vm14, %v2258_v56, %v2260_v57  ;;  %v988_v18 = vsel %vm986_vm14, %v2260_v57, %v2258_v56  ;;  %v1024_v56 = vcombine.high %v1584_v8, %v1584_v8  ;;  %v964_v57 = vadd.f32 %v962_v42, %v948_v41  ;;  %v1587_v42 = vld [vmem:[%s2763_s3 + $0xd0] sm:$0xff] }
 0x3f0   :  { %v2262_v15 = vpop.permute.xlu0 %998  ;;  %v994_v14 = vmul.f32 %v1582_v29, %v988_v18  ;;  %v995_v34 = vmul.f32 %v992_v54, %v987_v0  ;;  %v1588_v18 = vld [vmem:[%s2763_s3 + $0xd8] sm:$0xff]  ;;  %vm1251_vm14 = vcmp.lt.s32.totalorder %v1971_v45, 96 }
 0x3f1   :  { %v980_v1 = vadd.f32 %v978_v48, %v964_v57  ;;  %v1081_v26 = vcombine.high %v1588_v18, %v1588_v18 }
 0x3f2   :  { %v2264_v58 = vpop.permute.xlu1 %1000  ;;  %v997_v29 = vadd.f32 %v995_v34, %v981_v16  ;;  %v1590_v34 = vld [vmem:[%s2763_s3 + $0xe8] sm:$0xff] }
 0x3f3   :  { %v1003_v17 = vsel %vm1002_vm15, %v2262_v15, %v2264_v58  ;;  %v1004_v25 = vsel %vm1002_vm15, %v2264_v58, %v2262_v15  ;;  %v1585_v15 = vld [vmem:[%s2763_s3 + $0xc0] sm:$0xff]  ;;  %v996_v58 = vadd.f32 %v994_v14, %v980_v1  ;;  %vm1267_vm15 = vcmp.lt.s32.totalorder %v1971_v45, 95 }
 0x3f4   :  { %v2266_v59 = vpop.permute.xlu0 %1014  ;;  %v1010_v38 = vmul.f32 %v1583_v6, %v1004_v25  ;;  %v1011_v52 = vmul.f32 %v1008_v55, %v1003_v17  ;;  %v1033_v6 = vcombine.high %v1585_v15, %v1585_v15  ;;  %v1035_v48 = vmul.f32 %v1585_v15, %v2087_v49  ;;  %v1589_v49 = vld [vmem:[%s2763_s3 + $0xe0] sm:$0xff] }
 0x3f5   :  { %v1065_v17 = vcombine.high %v1587_v42, %v1587_v42  ;;  %v1097_v16 = vcombine.high %v1589_v49, %v1589_v49 }
 0x3f6   :  { %v2268_v20 = vpop.permute.xlu1 %1016  ;;  %v1013_v39 = vadd.f32 %v1011_v52, %v997_v29  ;;  %v1036_v9 = vmul.f32 %v1033_v6, %v2093_v4 }
 0x3f7   :  { %v1019_v36 = vsel %vm1018_vm0, %v2266_v59, %v2268_v20  ;;  %v1020_v50 = vsel %vm1018_vm0, %v2268_v20, %v2266_v59  ;;  %v1586_v59 = vld [vmem:[%s2763_s3 + $0xc8] sm:$0xff]  ;;  %v1012_v20 = vadd.f32 %v1010_v38, %v996_v58  ;;  %v1591_v38 = vld [vmem:[%s2763_s3 + $0xf0] sm:$0xff]  ;;  %vm1283_vm0 = vcmp.lt.s32.totalorder %v1971_v45, 94 }
 0x3f8   :  { %v2270_v60 = vpop.permute.xlu0 %1039  ;;  %v1026_v28 = vmul.f32 %v1584_v8, %v1020_v50  ;;  %v1027_v53 = vmul.f32 %v1024_v56, %v1019_v36  ;;  %v1049_v0 = vcombine.high %v1586_v59, %v1586_v59 }
 0x3fa   :  { %v2272_v61 = vpop.permute.xlu1 %1041  ;;  %v1028_v43 = vadd.f32 %v1026_v28, %v1012_v20  ;;  %v1029_v8 = vadd.f32 %v1027_v53, %v1013_v39 }
 0x3fb   :  { %v1044_v41 = vsel %vm1043_vm1, %v2270_v60, %v2272_v61  ;;  %v1045_v46 = vsel %vm1043_vm1, %v2272_v61, %v2270_v60  ;;  %vm1299_vm1 = vcmp.lt.s32.totalorder %v1971_v45, 93 }
 0x3fc   :  { %v2274_v62 = vpop.permute.xlu0 %1055  ;;  %v1037_v60 = vadd.f32 %v1035_v48, %v1028_v43  ;;  %v1038_v4 = vadd.f32 %v1036_v9, %v1029_v8  ;;  %v1051_v61 = vmul.f32 %v1586_v59, %v1044_v41  ;;  %v1052_v14 = vmul.f32 %v1049_v0, %v1045_v46  ;;  %v1592_v59 = vld [vmem:[%s2763_s3 + $0xf8] sm:$0xff]  ;;  %v1593_v0 = vld [vmem:[%s2763_s3 + $0x100] sm:$0xff] }
 0x3fe   :  { %v2276_v63 = vpop.permute.xlu1 %1057  ;;  %v1053_v58 = vadd.f32 %v1051_v61, %v1037_v60  ;;  %v1054_v29 = vadd.f32 %v1052_v14, %v1038_v4  ;;  %v1595_v14 = vld [vmem:[%s2763_s3 + $0x110] sm:$0xff] }
 0x3ff   :  { %v1060_v56 = vsel %vm1059_vm2, %v2274_v62, %v2276_v63  ;;  %v1061_v57 = vsel %vm1059_vm2, %v2276_v63, %v2274_v62  ;;  %vm1315_vm2 = vcmp.lt.s32.totalorder %v1971_v45, 83 }
 0x400   :  { %v2278_v19 = vpop.permute.xlu0 %1071  ;;  %v1067_v50 = vmul.f32 %v1587_v42, %v1060_v56  ;;  %v1068_v1 = vmul.f32 %v1065_v17, %v1061_v57  ;;  %v1594_v56 = vld [vmem:[%s2763_s3 + $0x108] sm:$0xff] }
 0x402   :  { %v2280_v3 = vpop.permute.xlu1 %1073  ;;  %v1070_v42 = vadd.f32 %v1068_v1, %v1054_v29 }
 0x403   :  { %v1076_v62 = vsel %vm1075_vm3, %v2278_v19, %v2280_v3  ;;  %v1077_v63 = vsel %vm1075_vm3, %v2280_v3, %v2278_v19  ;;  %v1113_v3 = vcombine.high %v1590_v34, %v1590_v34  ;;  %vm1331_vm3 = vcmp.lt.s32.totalorder %v1971_v45, 82 }
 0x404   :  { %v2282_v7 = vpop.permute.xlu0 %1087  ;;  %v1083_v28 = vmul.f32 %v1588_v18, %v1076_v62  ;;  %v1084_v53 = vmul.f32 %v1081_v26, %v1077_v63 }
 0x406   :  { %v2284_v10 = vpop.permute.xlu1 %1089  ;;  %v1086_v48 = vadd.f32 %v1084_v53, %v1070_v42  ;;  %v1597_v53 = vld [vmem:[%s2763_s3 + $0x120] sm:$0xff] }
 0x407   :  { %v1092_v15 = vsel %vm1091_vm4, %v2282_v7, %v2284_v10  ;;  %v1093_v19 = vsel %vm1091_vm4, %v2284_v10, %v2282_v7  ;;  %v1129_v7 = vcombine.high %v1591_v38, %v1591_v38  ;;  %v1069_v10 = vadd.f32 %v1067_v50, %v1053_v58 }
 0x408   :  { %v2286_v32 = vpop.permute.xlu0 %1103  ;;  %v1099_v43 = vmul.f32 %v1589_v49, %v1092_v15  ;;  %v1100_v8 = vmul.f32 %v1097_v16, %v1093_v19  ;;  %vm1347_vm4 = vcmp.lt.s32.totalorder %v1971_v45, 81 }
 0x409   :  { %v1085_v46 = vadd.f32 %v1083_v28, %v1069_v10 }
 0x40a   :  { %v2292_v11 = vpop.permute.xlu1 %1105  ;;  %v1102_v60 = vadd.f32 %v1100_v8, %v1086_v48  ;;  %v1599_v48 = vld [vmem:[%s2763_s3 + $0x130] sm:$0xff] }
 0x40b   :  { %v1108_v39 = vsel %vm1107_vm5, %v2286_v32, %v2292_v11  ;;  %v1109_v6 = vsel %vm1107_vm5, %v2292_v11, %v2286_v32  ;;  %v1145_v11 = vcombine.high %v1592_v59, %v1592_v59  ;;  %v1101_v49 = vadd.f32 %v1099_v43, %v1085_v46  ;;  %v1598_v43 = vld [vmem:[%s2763_s3 + $0x128] sm:$0xff] }
 0x40c   :  { %v2298_v24 = vpop.permute.xlu0 %1119  ;;  %v1115_v9 = vmul.f32 %v1590_v34, %v1108_v39  ;;  %v1116_v17 = vmul.f32 %v1113_v3, %v1109_v6  ;;  %vm1363_vm5 = vcmp.lt.s32.totalorder %v1971_v45, 80 }
 0x40e   :  { %v2304_v30 = vpop.permute.xlu1 %1121  ;;  %v1117_v63 = vadd.f32 %v1115_v9, %v1101_v49  ;;  %v1118_v50 = vadd.f32 %v1116_v17, %v1102_v60  ;;  %v1600_v49 = vld [vmem:[%s2763_s3 + $0x138] sm:$0xff] }
 0x40f   :  { %v1124_v41 = vsel %vm1123_vm6, %v2298_v24, %v2304_v30  ;;  %v1125_v32 = vsel %vm1123_vm6, %v2304_v30, %v2298_v24  ;;  %v1161_v30 = vcombine.high %v1593_v0, %v1593_v0  ;;  %vm1379_vm6 = vcmp.lt.s32.totalorder %v1971_v45, 79 }
 0x410   :  { %v2313_v5 = vpop.permute.xlu0 %1135  ;;  %v1131_v4 = vmul.f32 %v1591_v38, %v1124_v41  ;;  %v1132_v61 = vmul.f32 %v1129_v7, %v1125_v32  ;;  %v1596_v38 = vld [vmem:[%s2763_s3 + $0x118] sm:$0xff] }
 0x412   :  { %v2319_v51 = vpop.permute.xlu1 %1137  ;;  %v1133_v3 = vadd.f32 %v1131_v4, %v1117_v63  ;;  %v1134_v58 = vadd.f32 %v1132_v61, %v1118_v50 }
 0x413   :  { %v1140_v26 = vsel %vm1139_vm7, %v2313_v5, %v2319_v51  ;;  %v1141_v24 = vsel %vm1139_vm7, %v2319_v51, %v2313_v5  ;;  %v1177_v51 = vcombine.high %v1594_v56, %v1594_v56  ;;  %vm1395_vm7 = vcmp.lt.s32.totalorder %v1971_v45, 78 }
 0x414   :  { %v2327_v31 = vpop.permute.xlu0 %1151  ;;  %v1147_v1 = vmul.f32 %v1592_v59, %v1140_v26  ;;  %v1148_v16 = vmul.f32 %v1145_v11, %v1141_v24 }
 0x416   :  { %v2333_v12 = vpop.permute.xlu1 %1153  ;;  %v1149_v6 = vadd.f32 %v1147_v1, %v1133_v3  ;;  %v1150_v7 = vadd.f32 %v1148_v16, %v1134_v58 }
 0x417   :  { %v1156_v62 = vsel %vm1155_vm8, %v2327_v31, %v2333_v12  ;;  %v1157_v5 = vsel %vm1155_vm8, %v2333_v12, %v2327_v31  ;;  %v1193_v12 = vcombine.high %v1595_v14, %v1595_v14  ;;  %vm1411_vm8 = vcmp.lt.s32.totalorder %v1971_v45, 77 }
 0x418   :  { %v2347_v2 = vpop.permute.xlu0 %1167  ;;  %v1163_v29 = vmul.f32 %v1593_v0, %v1156_v62  ;;  %v1164_v28 = vmul.f32 %v1161_v30, %v1157_v5 }
 0x41a   :  { %v2358_v21 = vpop.permute.xlu1 %1169  ;;  %v1165_v41 = vadd.f32 %v1163_v29, %v1149_v6  ;;  %v1166_v32 = vadd.f32 %v1164_v28, %v1150_v7 }
 0x41b   :  { %v1172_v19 = vsel %vm1171_vm9, %v2347_v2, %v2358_v21  ;;  %v1173_v31 = vsel %vm1171_vm9, %v2358_v21, %v2347_v2  ;;  %v1209_v21 = vcombine.high %v1596_v38, %v1596_v38 }
 0x41c   :  { %v2368_v33 = vpop.permute.xlu0 %1183  ;;  %v1179_v10 = vmul.f32 %v1594_v56, %v1172_v19  ;;  %v1180_v42 = vmul.f32 %v1177_v51, %v1173_v31  ;;  %v1601_v51 = vld [vmem:[%s2763_s3 + $0x140] sm:$0xff]  ;;  %v1602_v31 = vld [vmem:[%s2763_s3 + $0x148] sm:$0xff] }
 0x41e   :  { %v2374_v13 = vpop.permute.xlu1 %1185  ;;  %v1181_v56 = vadd.f32 %v1179_v10, %v1165_v41  ;;  %v1182_v26 = vadd.f32 %v1180_v42, %v1166_v32 }
 0x41f   :  { %v1188_v39 = vsel %vm1187_vm10, %v2368_v33, %v2374_v13  ;;  %v1189_v2 = vsel %vm1187_vm10, %v2374_v13, %v2368_v33  ;;  %v1225_v13 = vcombine.high %v1597_v53, %v1597_v53 }
 0x420   :  { %v2379_v54 = vpop.permute.xlu0 %1199  ;;  %v1195_v11 = vmul.f32 %v1595_v14, %v1188_v39  ;;  %v1196_v46 = vmul.f32 %v1193_v12, %v1189_v2  ;;  %v1603_v39 = vld [vmem:[%s2763_s3 + $0x150] sm:$0xff] }
 0x422   :  { %v2385_v40 = vpop.permute.xlu1 %1201  ;;  %v1197_v61 = vadd.f32 %v1195_v11, %v1181_v56  ;;  %v1198_v14 = vadd.f32 %v1196_v46, %v1182_v26  ;;  %v1605_v46 = vld [vmem:[%s2763_s3 + $0x160] sm:$0xff] }
 0x423   :  { %v1204_v0 = vsel %vm1203_vm11, %v2379_v54, %v2385_v40  ;;  %v1205_v33 = vsel %vm1203_vm11, %v2385_v40, %v2379_v54  ;;  %v1241_v40 = vcombine.high %v1598_v43, %v1598_v43 }
 0x424   :  { %v2394_v55 = vpop.permute.xlu0 %1215  ;;  %v1211_v24 = vmul.f32 %v1596_v38, %v1204_v0  ;;  %v1212_v30 = vmul.f32 %v1209_v21, %v1205_v33 }
 0x426   :  { %v2403_v25 = vpop.permute.xlu1 %1217  ;;  %v1213_v1 = vadd.f32 %v1211_v24, %v1197_v61  ;;  %v1214_v16 = vadd.f32 %v1212_v30, %v1198_v14  ;;  %v1606_v30 = vld [vmem:[%s2763_s3 + $0x168] sm:$0xff] }
 0x427   :  { %v1220_v17 = vsel %vm1219_vm12, %v2394_v55, %v2403_v25  ;;  %v1221_v54 = vsel %vm1219_vm12, %v2403_v25, %v2394_v55  ;;  %v1257_v25 = vcombine.high %v1599_v48, %v1599_v48 }
 0x428   :  { %v2416_v36 = vpop.permute.xlu0 %1231  ;;  %v1227_v62 = vmul.f32 %v1597_v53, %v1220_v17  ;;  %v1228_v5 = vmul.f32 %v1225_v13, %v1221_v54 }
 0x42a   :  { %v2426_v52 = vpop.permute.xlu1 %1233  ;;  %v1229_v58 = vadd.f32 %v1227_v62, %v1213_v1  ;;  %v1230_v29 = vadd.f32 %v1228_v5, %v1214_v16  ;;  %v1607_v5 = vld [vmem:[%s2763_s3 + $0x170] sm:$0xff] }
 0x42b   :  { %v1236_v4 = vsel %vm1235_vm13, %v2416_v36, %v2426_v52  ;;  %v1237_v55 = vsel %vm1235_vm13, %v2426_v52, %v2416_v36  ;;  %v1273_v52 = vcombine.high %v1600_v49, %v1600_v49 }
 0x42c   :  { %v2440_v20 = vpop.permute.xlu0 %1247  ;;  %v1243_v38 = vmul.f32 %v1598_v43, %v1236_v4  ;;  %v1244_v19 = vmul.f32 %v1241_v40, %v1237_v55  ;;  %v1604_v43 = vld [vmem:[%s2763_s3 + $0x158] sm:$0xff]  ;;  %v1353_v55 = vcombine.high %v1605_v46, %v1605_v46 }
 0x42d   :  { %v1337_v40 = vcombine.high %v1604_v43, %v1604_v43 }
 0x42e   :  { %v2450_v18 = vpop.permute.xlu1 %1249  ;;  %v1245_v6 = vadd.f32 %v1243_v38, %v1229_v58  ;;  %v1246_v7 = vadd.f32 %v1244_v19, %v1230_v29  ;;  %v1608_v19 = vld [vmem:[%s2763_s3 + $0x178] sm:$0xff] }
 0x42f   :  { %v1252_v50 = vsel %vm1251_vm14, %v2440_v20, %v2450_v18  ;;  %v1253_v36 = vsel %vm1251_vm14, %v2450_v18, %v2440_v20  ;;  %v1289_v18 = vcombine.high %v1601_v51, %v1601_v51 }
 0x430   :  { %v2464_v57 = vpop.permute.xlu0 %1263  ;;  %v1259_v28 = vmul.f32 %v1599_v48, %v1252_v50  ;;  %v1260_v53 = vmul.f32 %v1257_v25, %v1253_v36  ;;  %v1369_v50 = vcombine.high %v1606_v30, %v1606_v30 }
 0x432   :  { %v2478_v34 = vpop.permute.xlu1 %1265  ;;  %v1261_v13 = vadd.f32 %v1259_v28, %v1245_v6  ;;  %v1262_v41 = vadd.f32 %v1260_v53, %v1246_v7 }
 0x433   :  { %v1268_v3 = vsel %vm1267_vm15, %v2464_v57, %v2478_v34  ;;  %v1269_v20 = vsel %vm1267_vm15, %v2478_v34, %v2464_v57  ;;  %v1305_v34 = vcombine.high %v1602_v31, %v1602_v31 }
 0x434   :  { %v2492_v15 = vpop.permute.xlu0 %1279  ;;  %v1275_v10 = vmul.f32 %v1600_v49, %v1268_v3  ;;  %v1276_v42 = vmul.f32 %v1273_v52, %v1269_v20  ;;  %v1385_v3 = vcombine.high %v1607_v5, %v1607_v5 }
 0x436   :  { %v2506_v59 = vpop.permute.xlu1 %1281 }
 0x437   :  { %v1284_v21 = vsel %vm1283_vm0, %v2492_v15, %v2506_v59  ;;  %v1285_v57 = vsel %vm1283_vm0, %v2506_v59, %v2492_v15  ;;  %v1321_v59 = vcombine.high %v1603_v39, %v1603_v39 }
 0x438   :  { %v2520_v8 = vpop.permute.xlu0 %1295  ;;  %v1291_v32 = vmul.f32 %v1601_v51, %v1284_v21  ;;  %v1292_v11 = vmul.f32 %v1289_v18, %v1285_v57 }
 0x43a   :  { %v1298_v9 = vpop.permute.xlu1 %1297 }
 0x43b   :  { %v1300_v33 = vsel %vm1299_vm1, %v2520_v8, %v1298_v9  ;;  %v1301_v15 = vsel %vm1299_vm1, %v1298_v9, %v2520_v8  ;;  %v1277_v8 = vadd.f32 %v1275_v10, %v1261_v13  ;;  %v1278_v9 = vadd.f32 %v1276_v42, %v1262_v41  ;;  %v1609_v10 = vld [vmem:[%s2763_s3 + $0x180] sm:$0xff] }
 0x43c   :  { %v1312_v60 = vpop.permute.xlu0 %1311  ;;  %v1307_v56 = vmul.f32 %v1602_v31, %v1300_v33  ;;  %v1308_v26 = vmul.f32 %v1305_v34, %v1301_v15  ;;  %v1417_v41 = vcombine.high %v1609_v10, %v1609_v10 }
 0x43d   :  { %v1294_v25 = vadd.f32 %v1292_v11, %v1278_v9 }
 0x43e   :  { %v1314_v63 = vpop.permute.xlu1 %1313 }
 0x43f   :  { %v1316_v17 = vsel %vm1315_vm2, %v1312_v60, %v1314_v63  ;;  %v1317_v54 = vsel %vm1315_vm2, %v1314_v63, %v1312_v60  ;;  %v1293_v60 = vadd.f32 %v1291_v32, %v1277_v8  ;;  %v1310_v52 = vadd.f32 %v1308_v26, %v1294_v25 }
 0x440   :  { %v1328_v12 = vpop.permute.xlu0 %1327  ;;  %v1323_v61 = vmul.f32 %v1603_v39, %v1316_v17  ;;  %v1324_v14 = vmul.f32 %v1321_v59, %v1317_v54 }
 0x441   :  { %v1309_v36 = vadd.f32 %v1307_v56, %v1293_v60 }
 0x442   :  { %v1330_v2 = vpop.permute.xlu1 %1329  ;;  %v1326_v18 = vadd.f32 %v1324_v14, %v1310_v52 }
 0x443   :  { %v1332_v49 = vsel %vm1331_vm3, %v1328_v12, %v1330_v2  ;;  %v1333_v4 = vsel %vm1331_vm3, %v1330_v2, %v1328_v12  ;;  %v1325_v20 = vadd.f32 %v1323_v61, %v1309_v36  ;;  %v1401_v2 = vcombine.high %v1608_v19, %v1608_v19 }
 0x444   :  { %v1344_v0 = vpop.permute.xlu0 %1343  ;;  %v1339_v1 = vmul.f32 %v1604_v43, %v1332_v49  ;;  %v1340_v16 = vmul.f32 %v1337_v40, %v1333_v4 }
 0x446   :  { %v1346_v48 = vpop.permute.xlu1 %1345  ;;  %v1341_v21 = vadd.f32 %v1339_v1, %v1325_v20  ;;  %v1342_v57 = vadd.f32 %v1340_v16, %v1326_v18 }
 0x447   :  { %v1348_v51 = vsel %vm1347_vm4, %v1344_v0, %v1346_v48  ;;  %v1349_v63 = vsel %vm1347_vm4, %v1346_v48, %v1344_v0 }
 0x448   :  { %v1360_v24 = vpop.permute.xlu0 %1359  ;;  %v1355_v58 = vmul.f32 %v1605_v46, %v1348_v51  ;;  %v1356_v29 = vmul.f32 %v1353_v55, %v1349_v63 }
 0x44a   :  { %v1362_v62 = vpop.permute.xlu1 %1361  ;;  %v1357_v42 = vadd.f32 %v1355_v58, %v1341_v21  ;;  %v1358_v43 = vadd.f32 %v1356_v29, %v1342_v57  ;;  %v2777_v57 = vld [vmem:[#allocation2_spill] sm:$0xff] }
 0x44b   :  { %v1364_v31 = vsel %vm1363_vm5, %v1360_v24, %v1362_v62  ;;  %v1365_v12 = vsel %vm1363_vm5, %v1362_v62, %v1360_v24 }
 0x44c   :  { %v1376_v38 = vpop.permute.xlu0 %1375  ;;  %v1371_v34 = vmul.f32 %v1606_v30, %v1364_v31  ;;  %v1372_v6 = vmul.f32 %v1369_v50, %v1365_v12 }
 0x44e   :  { %v1378_v28 = vpop.permute.xlu1 %1377  ;;  %v1373_v32 = vadd.f32 %v1371_v34, %v1357_v42  ;;  %v1374_v11 = vadd.f32 %v1372_v6, %v1358_v43  ;;  %v2778_v34 = vld [vmem:[#allocation3_spill] sm:$0xff]  ;;  %v2780_v42 = vld [vmem:[#allocation5_spill] sm:$0xff] }
 0x44f   :  { %v1380_v53 = vsel %vm1379_vm6, %v1376_v38, %v1378_v28  ;;  %v1381_v39 = vsel %vm1379_vm6, %v1378_v28, %v1376_v38 }
 0x450   :  { %v1392_v7 = vpop.permute.xlu0 %1391  ;;  %v1387_v0 = vmul.f32 %v1607_v5, %v1380_v53  ;;  %v1388_v33 = vmul.f32 %v1385_v3, %v1381_v39 }
 0x452   :  { %v1394_v15 = vpop.permute.xlu1 %1393  ;;  %v1389_v17 = vadd.f32 %v1387_v0, %v1373_v32  ;;  %v1390_v54 = vadd.f32 %v1388_v33, %v1374_v11 }
 0x453   :  { %v1396_v59 = vsel %vm1395_vm7, %v1392_v7, %v1394_v15  ;;  %v1397_v13 = vsel %vm1395_vm7, %v1394_v15, %v1392_v7  ;;  %v2779_v7 = vld [vmem:[#allocation4_spill] sm:$0xff] }
 0x454   :  { %v1403_v46 = vmul.f32 %v1608_v19, %v1396_v59  ;;  %v1404_v48 = vmul.f32 %v1401_v2, %v1397_v13  ;;  %v1408_v40 = vpop.permute.xlu0 %1407 }
 0x456   :  { %v1410_v8 = vpop.permute.xlu1 %1409  ;;  %v1405_v26 = vadd.f32 %v1403_v46, %v1389_v17  ;;  %v1406_v24 = vadd.f32 %v1404_v48, %v1390_v54 }
 0x457   :  { %v1412_v9 = vsel %vm1411_vm8, %v1408_v40, %v1410_v8  ;;  %v1413_v56 = vsel %vm1411_vm8, %v1410_v8, %v1408_v40 }
 0x458   :  { %v1419_v30 = vmul.f32 %v1609_v10, %v1412_v9  ;;  %v1420_v49 = vmul.f32 %v1417_v41, %v1413_v56  ;;  %v1747_v56 = vld [vmem:[%s2760_s0] sm:$0xff] }
 0x45a   :  { %v1421_v4 = vadd.f32 %v1419_v30, %v1405_v26  ;;  %v1422_v55 = vadd.f32 %v1420_v49, %v1406_v24  ;;  %v1748_v24 = vld [vmem:[%s2760_s0 + $0x8] sm:$0xff]  ;;  %v1749_v49 = vld [vmem:[%s2760_s0 + $0x10] sm:$0xff] }
 0x45c   :  { %v1425_v60 = vrot.slane %v1421_v4, 2  ;;  %v1426_v25 = vrot.slane %v1422_v55, 2 }
 0x45e   :  { %v1429_v45 = vadd.f32 %v1425_v60, %v1421_v4  ;;  %v1430_v61 = vadd.f32 %v1426_v25, %v1422_v55  ;;  %v1750_v55 = vld [vmem:[%s2760_s0 + $0x18] sm:$0xff]  ;;  %v1751_v25 = vld [vmem:[%s2760_s0 + $0x20] sm:$0xff] }
 0x460   :  { %v1610_v14 = vmul.f32 -1.442695, %v1429_v45  ;;  %v1611_v62 = vmul.f32 -1.442695, %v1430_v61  ;;  %v1752_v61 = vld [vmem:[%s2760_s0 + $0x28] sm:$0xff] }
 0x462   :  { %1739 = vpow2.f32 %v1610_v14 }
 0x463   :  { %1741 = vpow2.f32 %v1611_v62  ;;  %v1753_v62 = vld [vmem:[%s2760_s0 + $0x30] sm:$0xff] }
 0x46f   :  { %v1740_v5 = vpop.eup %1739 }
 0x470   :  { %v1742_v51 = vpop.eup %1741  ;;  %v1437_v63 = vadd.f32 1.0, %v1740_v5 }
 0x471   :  { %v1438_v50 = vadd.f32 1.0, %v1742_v51  ;;  %v1754_v51 = vld [vmem:[%s2760_s0 + $0x38] sm:$0xff] }
 0x472   :  { %1743 = vrcp.f32 %v1437_v63 }
 0x473   :  { %1745 = vrcp.f32 %v1438_v50  ;;  %v1755_v50 = vld [vmem:[%s2760_s0 + $0x40] sm:$0xff] }
 0x47f   :  { %v1744_v36 = vpop.eup %1743 }
 0x480   :  { %v1746_v52 = vpop.eup %1745 }
 0x481   :  { %v1445_v1 = vcombine.low %v1744_v36, %v1746_v52  ;;  %v1756_v52 = vld [vmem:[%s2760_s0 + $0x48] sm:$0xff] }
 0x483   :  { %v1452_v16 = vrot.slane %v1445_v1, %v2024_v23 }
 0x485   :  { %v1453_v38 = vcombine.high %v1452_v16, %v1452_v16  ;;  %v1460_v19 = vrot.slane %v1452_v16, %v2024_v23  ;;  %v1757_v16 = vld [vmem:[%s2760_s0 + $0x50] sm:$0xff] }
 0x487   :  { %v1467_v31 = vrot.slane %v1453_v38, %v2024_v23  ;;  %v1471_v12 = vrot.slane %v1460_v19, %v2021_v22  ;;  %v1475_v3 = vrot.slane %v1460_v19, %v2029_v27  ;;  %v1758_v19 = vld [vmem:[%s2760_s0 + $0x58] sm:$0xff] }
 0x489   :  { %v1479_v20 = vrot.slane %v1467_v31, %v2021_v22  ;;  %v1483_v18 = vrot.slane %v1467_v31, %v2029_v27  ;;  %v1488_v58 = vmul.f32 %v1471_v12, %v2042_v35  ;;  %v1489_v29 = vmul.f32 %v1475_v3, %v2042_v35 }
 0x48a   :  { %v1490_v28 = vmul.f32 %v1471_v12, %v2036_v47  ;;  %v1491_v53 = vmul.f32 %v1475_v3, %v2036_v47  ;;  %v1492_v39 = vmul.f32 %v1471_v12, %v2046_v37  ;;  %v1493_v23 = vmul.f32 %v1475_v3, %v2046_v37 }
 0x48b   :  { %v1494_v2 = vmul.f32 %v1471_v12, %v2060_v44  ;;  %v1495_v21 = vmul.f32 %v1475_v3, %v2060_v44  ;;  %v1496_v22 = vmul.f32 %v1479_v20, %v2777_v57  ;;  %v1497_v27 = vmul.f32 %v1483_v18, %v2777_v57  ;;  %v1759_v12 = vld [vmem:[%s2760_s0 + $0x60] sm:$0xff] }
 0x48c   :  { %v1498_v6 = vmul.f32 %v1479_v20, %v2778_v34  ;;  %v1499_v35 = vmul.f32 %v1483_v18, %v2778_v34  ;;  %v1500_v10 = vmul.f32 %v1479_v20, %v2779_v7  ;;  %v1501_v47 = vmul.f32 %v1483_v18, %v2779_v7 }
 0x48d   :  { %v1502_v43 = vmul.f32 %v1479_v20, %v2780_v42  ;;  %v1503_v37 = vmul.f32 %v1483_v18, %v2780_v42  ;;  %v1504_v0 = vadd.f32 1.0, %v1488_v58  ;;  %v1505_v33 = vadd.f32 1.0, %v1489_v29  ;;  %v1760_v20 = vld [vmem:[%s2760_s0 + $0x68] sm:$0xff]  ;;  %v1761_v58 = vld [vmem:[%s2760_s0 + $0x70] sm:$0xff] }
 0x48e   :  { %v1506_v15 = vadd.f32 1.0, %v1490_v28  ;;  %v1507_v44 = vadd.f32 1.0, %v1491_v53  ;;  %v1508_v59 = vadd.f32 1.0, %v1492_v39  ;;  %v1509_v13 = vadd.f32 1.0, %v1493_v23  ;;  %v1762_v28 = vld [vmem:[%s2760_s0 + $0x78] sm:$0xff] }
 0x48f   :  { %v1510_v41 = vadd.f32 1.0, %v1494_v2  ;;  %v1511_v32 = vadd.f32 1.0, %v1495_v21  ;;  %v1512_v11 = vadd.f32 1.0, %v1496_v22  ;;  %v1513_v46 = vadd.f32 1.0, %v1497_v27 }
 0x490   :  { %v1514_v48 = vadd.f32 1.0, %v1498_v6  ;;  %v1515_v17 = vadd.f32 1.0, %v1499_v35  ;;  %v1516_v54 = vadd.f32 1.0, %v1500_v10  ;;  %v1517_v40 = vadd.f32 1.0, %v1501_v47 }
 0x491   :  { %v1518_v8 = vadd.f32 1.0, %v1502_v43  ;;  %v1519_v9 = vadd.f32 1.0, %v1503_v37  ;;  %v1520_v26 = vmul.f32 %v1747_v56, %v1504_v0  ;;  %v1521_v30 = vmul.f32 %v1748_v24, %v1505_v33 }
 0x492   :  { %v1522_v4 = vmul.f32 %v1749_v49, %v1506_v15  ;;  %v1523_v60 = vmul.f32 %v1750_v55, %v1507_v44  ;;  %v1524_v45 = vmul.f32 %v1751_v25, %v1508_v59  ;;  %v1525_v14 = vmul.f32 %v1752_v61, %v1509_v13 }
 0x493   :  { %v1526_v5 = vmul.f32 %v1753_v62, %v1510_v41  ;;  %v1527_v63 = vmul.f32 %v1754_v51, %v1511_v32  ;;  %v1528_v36 = vmul.f32 %v1755_v50, %v1512_v11  ;;  %v1529_v1 = vmul.f32 %v1756_v52, %v1513_v46  ;;  %1536 = vst [vmem:[%s2764_s4] sm:$0xff] %v1520_v26 }
 0x494   :  { %1537 = vst [vmem:[%s2764_s4 + $0x8] sm:$0xff] %v1521_v30  ;;  %v1530_v38 = vmul.f32 %v1757_v16, %v1514_v48  ;;  %v1531_v31 = vmul.f32 %v1758_v19, %v1515_v17  ;;  %v1532_v3 = vmul.f32 %v1759_v12, %v1516_v54  ;;  %v1533_v18 = vmul.f32 %v1760_v20, %v1517_v40 }
 0x495   :  { %1538 = vst [vmem:[%s2764_s4 + $0x10] sm:$0xff] %v1522_v4  ;;  %1539 = vst [vmem:[%s2764_s4 + $0x18] sm:$0xff] %v1523_v60  ;;  %v1534_v29 = vmul.f32 %v1761_v58, %v1518_v8  ;;  %v1535_v53 = vmul.f32 %v1762_v28, %v1519_v9 }
 0x496   :  { %1540 = vst [vmem:[%s2764_s4 + $0x20] sm:$0xff] %v1524_v45  ;;  %1541 = vst [vmem:[%s2764_s4 + $0x28] sm:$0xff] %v1525_v14 }
 0x497   :  { %1542 = vst [vmem:[%s2764_s4 + $0x30] sm:$0xff] %v1526_v5  ;;  %1543 = vst [vmem:[%s2764_s4 + $0x38] sm:$0xff] %v1527_v63 }
 0x498   :  { %1544 = vst [vmem:[%s2764_s4 + $0x40] sm:$0xff] %v1528_v36  ;;  %1545 = vst [vmem:[%s2764_s4 + $0x48] sm:$0xff] %v1529_v1 }
 0x499   :  { %1546 = vst [vmem:[%s2764_s4 + $0x50] sm:$0xff] %v1530_v38  ;;  %1547 = vst [vmem:[%s2764_s4 + $0x58] sm:$0xff] %v1531_v31 }
 0x49a   :  { %1548 = vst [vmem:[%s2764_s4 + $0x60] sm:$0xff] %v1532_v3  ;;  %1549 = vst [vmem:[%s2764_s4 + $0x68] sm:$0xff] %v1533_v18 }
 0x49b   :  { %1550 = vst [vmem:[%s2764_s4 + $0x70] sm:$0xff] %v1534_v29  ;;  %1551 = vst [vmem:[%s2764_s4 + $0x78] sm:$0xff] %v1535_v53 }

</bundles_post_ra>
